<compile_context>
chip_gen: v7x
topology: tpu7x:2x2x1
jax: 0.10.0
libtpu: 0.0.40
codegen_flags: <defaults>
</compile_context>

<pallas_src>
import functools
import math

import jax
import jax.numpy as jnp
from jax import lax
from jax.experimental import pallas as pl
from jax.experimental.pallas import tpu as pltpu

NEG_INF = -1e30
LN_EPS = 1e-5


def _layernorm(x, w, b):
    # x: (R, D), w/b: (1, D).  PyTorch LayerNorm (biased variance, eps inside sqrt).
    mu = jnp.mean(x, axis=-1, keepdims=True)
    var = jnp.mean((x - mu) ** 2, axis=-1, keepdims=True)
    return (x - mu) * lax.rsqrt(var + LN_EPS) * w + b


def _encoder_kernel(num_layers,
                    x_ref, keep_ref,
                    ln1_w, ln1_b, wq, bq, wk, bk, wv, bv, wo, bo,
                    ln2_w, ln2_b, w1, b1, w2, b2,
                    lnf_w, lnf_b, sparse_w,
                    out_ref):
    TB, S, D = x_ref.shape
    h = x_ref[...].astype(jnp.float32).reshape(TB * S, D)     # (TB*S, D) slab

    # ---- attention mask built in-kernel from the (TB,1,S) keep-mask ----
    row = lax.broadcasted_iota(jnp.int32, (S, S), 0)
    col = lax.broadcasted_iota(jnp.int32, (S, S), 1)
    future = col > row                       # causal
    offdiag = col != row                     # diagonal never masked
    pad_key = keep_ref[...] < 0.5            # (TB,1,S) True where key is padding
    masked = offdiag[None, :, :] & (future[None, :, :] | pad_key)   # (TB,S,S)

    # TODO(synk): for large num_layers move this static unroll to a layer grid
    # axis (weights blocked per layer) to bound VMEM residency / vreg pressure.
    for l in range(num_layers):
        # ---- self-attention sub-block (norm_first=True, nhead=1) ----
        y = _layernorm(h, ln1_w[l], ln1_b[l])
        yb = y.astype(jnp.bfloat16)
        # (in,out) weight layout; 1/sqrt(D) already baked into wq/bq.
        q = jnp.dot(yb, wq[l], preferred_element_type=jnp.float32) + bq[l]
        k = jnp.dot(yb, wk[l], preferred_element_type=jnp.float32) + bk[l]
        v = jnp.dot(yb, wv[l], preferred_element_type=jnp.float32) + bv[l]
        q3 = q.reshape(TB, S, D).astype(jnp.bfloat16)
        k3 = k.reshape(TB, S, D).astype(jnp.bfloat16)
        v3 = v.reshape(TB, S, D).astype(jnp.bfloat16)

        scores = jnp.einsum('bqd,bkd->bqk', q3, k3,
                            preferred_element_type=jnp.float32)      # (TB,S,S)
        scores = jnp.where(masked, NEG_INF, scores)
        scores = scores - jnp.max(scores, axis=-1, keepdims=True)
        p = jnp.exp(scores)
        p = p * pl.reciprocal(jnp.sum(p, axis=-1, keepdims=True), approx=True)

        attn = jnp.einsum('bqk,bkd->bqd', p.astype(jnp.bfloat16), v3,
                          preferred_element_type=jnp.float32)         # (TB,S,D)
        attn = attn.reshape(TB * S, D)
        attn = jnp.dot(attn.astype(jnp.bfloat16), wo[l],
                       preferred_element_type=jnp.float32) + bo[l]
        h = h + attn

        # ---- feed-forward sub-block (ReLU, dim_feedforward == hidden) ----
        y = _layernorm(h, ln2_w[l], ln2_b[l])
        f = jnp.dot(y.astype(jnp.bfloat16), w1[l],
                    preferred_element_type=jnp.float32) + b1[l]
        f = jnp.maximum(f, 0.0)
        f = jnp.dot(f.astype(jnp.bfloat16), w2[l],
                    preferred_element_type=jnp.float32) + b2[l]
        h = h + f

    # TransformerEncoder final norm (= last_layernorm)
    h = _layernorm(h, lnf_w[0], lnf_b[0])
    # SparseAttentionMask applied to the prediction head (elementwise scaling).
    # TODO(synk): SparseAttentionMask definition not provided; modeled as a
    # learnable (max_len, hidden) multiplicative mask broadcast over batch.
    out = h.reshape(TB, S, D) * sparse_w[...][None, :, :]
    out_ref[...] = out.astype(out_ref.dtype)


def _pick_batch_block(batch, seq, target_rows=256):
    """Largest divisor of `batch` so that TB*S is roughly >= target_rows."""
    want = max(1, -(-target_rows // seq))
    tb = 1
    for cand in range(1, batch + 1):
        if batch % cand == 0 and cand <= want:
            tb = cand
    if want >= batch:
        tb = batch
    return tb


def improvised_sasrec_forward(positives, mask, params, *, batch_block=None):
    """positives: (B, S) int32 item ids; mask: (B, S) 0/1 padding mask."""
    B, S = positives.shape
    D = params["item_emb"].shape[-1]
    L = params["wq"].shape[0]
    scale = 1.0 / math.sqrt(D)

    # ---- glue: embeddings + dynamic position embedding (gathers stay in JAX) ----
    # TODO(synk): DynamicPositionEmbedding definition not provided; modeled as
    # x + pos_table[:seq_len].
    x = (params["item_emb"][positives] + params["pos_emb"][:S][None, :, :])
    x = x.astype(jnp.float32)

    # ---- glue: only the tiny (B,1,S) keep-mask crosses HBM; full mask in-kernel ----
    keep = mask.astype(jnp.float32).reshape(B, 1, S)

    # ---- weight prep: transpose to (in,out), bake scale into Wq/bq, bf16 matmul weights ----
    def to_inout_bf16(w):
        return jnp.swapaxes(w, -1, -2).astype(jnp.bfloat16)

    wq = (jnp.swapaxes(params["wq"], -1, -2) * scale).astype(jnp.bfloat16)
    bq = (params["bq"] * scale).astype(jnp.float32)
    wk = to_inout_bf16(params["wk"])
    wv = to_inout_bf16(params["wv"])
    wo = to_inout_bf16(params["wo"])
    w1 = to_inout_bf16(params["w1"])
    w2 = to_inout_bf16(params["w2"])

    weights = (params["ln1_w"], params["ln1_b"],
               wq, bq, wk, params["bk"],
               wv, params["bv"], wo, params["bo"],
               params["ln2_w"], params["ln2_b"],
               w1, params["b1"], w2, params["b2"],
               params["lnf_w"], params["lnf_b"],
               params["sparse_w"][:S])

    TB = batch_block if batch_block is not None else _pick_batch_block(B, S)
    assert B % TB == 0
    grid = (B // TB,)

    def full_spec(a):
        nd = a.ndim
        return pl.BlockSpec(a.shape, lambda b, _n=nd: (0,) * _n)

    kernel = functools.partial(_encoder_kernel, L)
    # NOTE: for large (L, D) configs raise vmem_limit_bytes / move to a layer
    # grid axis; at these demo shapes the default scoped VMEM is ample.
    return pl.pallas_call(
        kernel,
        out_shape=jax.ShapeDtypeStruct((B, S, D), jnp.float32),
        grid=grid,
        in_specs=[pl.BlockSpec((TB, S, D), lambda b: (b, 0, 0)),
                  pl.BlockSpec((TB, 1, S), lambda b: (b, 0, 0))]
                 + [full_spec(w) for w in weights],
        out_specs=pl.BlockSpec((TB, S, D), lambda b: (b, 0, 0)),
        compiler_params=pltpu.CompilerParams(
            dimension_semantics=("parallel",)),
    )(x, keep, *weights)


def init_params(key, item_num, max_len, hidden_size, num_layers):
    D, L = hidden_size, num_layers
    ks = jax.random.split(key, 12)

    def xavier(k, shape):
        fan_out, fan_in = shape[-2], shape[-1]
        lim = math.sqrt(6.0 / (fan_in + fan_out))
        return jax.random.uniform(k, shape, jnp.float32, -lim, lim)

    item_emb = xavier(ks[0], (item_num + 1, D)).at[0].set(0.0)  # padding_idx=0
    pos_emb = xavier(ks[1], (max_len, D))

    params = dict(
        item_emb=item_emb,
        pos_emb=pos_emb,
        # per-layer weights stacked along leading L axis; torch (out, in) layout
        wq=xavier(ks[2], (L, D, D)),
        wk=xavier(ks[3], (L, D, D)),
        wv=xavier(ks[4], (L, D, D)),
        wo=xavier(ks[5], (L, D, D)),
        w1=xavier(ks[6], (L, D, D)),   # dim_feedforward == hidden_size
        w2=xavier(ks[7], (L, D, D)),
        bq=jnp.zeros((L, 1, D), jnp.float32),
        bk=jnp.zeros((L, 1, D), jnp.float32),
        bv=jnp.zeros((L, 1, D), jnp.float32),
        bo=jnp.zeros((L, 1, D), jnp.float32),
        b1=jnp.zeros((L, 1, D), jnp.float32),
        b2=jnp.zeros((L, 1, D), jnp.float32),
        ln1_w=jnp.ones((L, 1, D), jnp.float32),
        ln1_b=jnp.zeros((L, 1, D), jnp.float32),
        ln2_w=jnp.ones((L, 1, D), jnp.float32),
        ln2_b=jnp.zeros((L, 1, D), jnp.float32),
        lnf_w=jnp.ones((1, 1, D), jnp.float32),
        lnf_b=jnp.zeros((1, 1, D), jnp.float32),
        sparse_w=jax.random.uniform(ks[8], (max_len, D), jnp.float32, 0.5, 1.0),
    )
    return params


if __name__ == "__main__":
    B, S, D, L, ITEM_NUM = 2, 8, 32, 2, 100

    key = jax.random.PRNGKey(0)
    k_params, k_items = jax.random.split(key)
    params = init_params(k_params, ITEM_NUM, S, D, L)

    # deterministic small inputs: item ids in [1, ITEM_NUM], first 2 positions padded
    positives = jax.random.randint(k_items, (B, S), 1, ITEM_NUM + 1, dtype=jnp.int32)
    positives = positives.at[:, :2].set(0)                 # padded prefix
    mask = (positives > 0).astype(jnp.int32)               # 0 = padded, 1 = real

    out = improvised_sasrec_forward(positives, mask, params)
    out = jax.block_until_ready(out)
    assert out.shape == (B, S, D)
    assert bool(jnp.isfinite(out).all())
    print("KERNEL_OK")
</pallas_src>

<mosaic_0001>
module attributes {stable_mosaic.version = 11 : i64} {
  func.func @_encoder_kernel(%arg0: i32, %arg1: memref<2x8x32xf32, #tpu.memory_space<vmem>>, %arg2: memref<2x1x8xf32, #tpu.memory_space<vmem>>, %arg3: memref<2x1x32xf32, #tpu.memory_space<vmem>>, %arg4: memref<2x1x32xf32, #tpu.memory_space<vmem>>, %arg5: memref<2x32x32xbf16, #tpu.memory_space<vmem>>, %arg6: memref<2x1x32xf32, #tpu.memory_space<vmem>>, %arg7: memref<2x32x32xbf16, #tpu.memory_space<vmem>>, %arg8: memref<2x1x32xf32, #tpu.memory_space<vmem>>, %arg9: memref<2x32x32xbf16, #tpu.memory_space<vmem>>, %arg10: memref<2x1x32xf32, #tpu.memory_space<vmem>>, %arg11: memref<2x32x32xbf16, #tpu.memory_space<vmem>>, %arg12: memref<2x1x32xf32, #tpu.memory_space<vmem>>, %arg13: memref<2x1x32xf32, #tpu.memory_space<vmem>>, %arg14: memref<2x1x32xf32, #tpu.memory_space<vmem>>, %arg15: memref<2x32x32xbf16, #tpu.memory_space<vmem>>, %arg16: memref<2x1x32xf32, #tpu.memory_space<vmem>>, %arg17: memref<2x32x32xbf16, #tpu.memory_space<vmem>>, %arg18: memref<2x1x32xf32, #tpu.memory_space<vmem>>, %arg19: memref<1x1x32xf32, #tpu.memory_space<vmem>>, %arg20: memref<1x1x32xf32, #tpu.memory_space<vmem>>, %arg21: memref<8x32xf32, #tpu.memory_space<vmem>>, %arg22: memref<2x8x32xf32, #tpu.memory_space<vmem>>) attributes {dimension_semantics = [#tpu.dimension_semantics<parallel>], iteration_bounds = array<i64: 1>, scalar_prefetch = 0 : i64, scratch_operands = 0 : i64, tpu.core_type = #tpu.core_type<tc>, window_params = [{transform_indices = @transform_0, window_bounds = array<i64: 2, 8, 32>}, {transform_indices = @transform_1, window_bounds = array<i64: 2, 1, 8>}, {pipeline_mode = #tpu.pipeline_mode<synchronous>, transform_indices = @transform_2, window_bounds = array<i64: 2, 1, 32>}, {pipeline_mode = #tpu.pipeline_mode<synchronous>, transform_indices = @transform_3, window_bounds = array<i64: 2, 1, 32>}, {pipeline_mode = #tpu.pipeline_mode<synchronous>, transform_indices = @transform_4, window_bounds = array<i64: 2, 32, 32>}, {pipeline_mode = #tpu.pipeline_mode<synchronous>, transform_indices = @transform_5, window_bounds = array<i64: 2, 1, 32>}, {pipeline_mode = #tpu.pipeline_mode<synchronous>, transform_indices = @transform_6, window_bounds = array<i64: 2, 32, 32>}, {pipeline_mode = #tpu.pipeline_mode<synchronous>, transform_indices = @transform_7, window_bounds = array<i64: 2, 1, 32>}, {pipeline_mode = #tpu.pipeline_mode<synchronous>, transform_indices = @transform_8, window_bounds = array<i64: 2, 32, 32>}, {pipeline_mode = #tpu.pipeline_mode<synchronous>, transform_indices = @transform_9, window_bounds = array<i64: 2, 1, 32>}, {pipeline_mode = #tpu.pipeline_mode<synchronous>, transform_indices = @transform_10, window_bounds = array<i64: 2, 32, 32>}, {pipeline_mode = #tpu.pipeline_mode<synchronous>, transform_indices = @transform_11, window_bounds = array<i64: 2, 1, 32>}, {pipeline_mode = #tpu.pipeline_mode<synchronous>, transform_indices = @transform_12, window_bounds = array<i64: 2, 1, 32>}, {pipeline_mode = #tpu.pipeline_mode<synchronous>, transform_indices = @transform_13, window_bounds = array<i64: 2, 1, 32>}, {pipeline_mode = #tpu.pipeline_mode<synchronous>, transform_indices = @transform_14, window_bounds = array<i64: 2, 32, 32>}, {pipeline_mode = #tpu.pipeline_mode<synchronous>, transform_indices = @transform_15, window_bounds = array<i64: 2, 1, 32>}, {pipeline_mode = #tpu.pipeline_mode<synchronous>, transform_indices = @transform_16, window_bounds = array<i64: 2, 32, 32>}, {pipeline_mode = #tpu.pipeline_mode<synchronous>, transform_indices = @transform_17, window_bounds = array<i64: 2, 1, 32>}, {pipeline_mode = #tpu.pipeline_mode<synchronous>, transform_indices = @transform_18, window_bounds = array<i64: 1, 1, 32>}, {pipeline_mode = #tpu.pipeline_mode<synchronous>, transform_indices = @transform_19, window_bounds = array<i64: 1, 1, 32>}, {pipeline_mode = #tpu.pipeline_mode<synchronous>, transform_indices = @transform_20, window_bounds = array<i64: 8, 32>}, {transform_indices = @transform_21, window_bounds = array<i64: 2, 8, 32>}]} {
    %c0 = arith.constant 0 : index
    %c0_0 = arith.constant 0 : index
    %c0_1 = arith.constant 0 : index
    %0 = vector.load %arg1[%c0, %c0_0, %c0_1] : memref<2x8x32xf32, #tpu.memory_space<vmem>>, vector<2x8x32xf32>
    %1 = vector.shape_cast %0 : vector<2x8x32xf32> to vector<16x32xf32>
    %2 = tpu.iota {dimensions = array<i32: 0>} : vector<8x8xi32>
    %3 = tpu.iota {dimensions = array<i32: 1>} : vector<8x8xi32>
    %4 = arith.cmpi sgt, %3, %2 : vector<8x8xi32>
    %5 = arith.cmpi ne, %3, %2 : vector<8x8xi32>
    %c0_2 = arith.constant 0 : index
    %c0_3 = arith.constant 0 : index
    %c0_4 = arith.constant 0 : index
    %6 = vector.load %arg2[%c0_2, %c0_3, %c0_4] : memref<2x1x8xf32, #tpu.memory_space<vmem>>, vector<2x1x8xf32>
    %cst = arith.constant 5.000000e-01 : f32
    %7 = vector.broadcast %cst : f32 to vector<2x1x8xf32>
    %8 = arith.cmpf olt, %6, %7 : vector<2x1x8xf32>
    %9 = vector.shape_cast %5 : vector<8x8xi1> to vector<1x8x8xi1>
    %10 = vector.shape_cast %4 : vector<8x8xi1> to vector<1x8x8xi1>
    %11 = vector.broadcast %10 : vector<1x8x8xi1> to vector<2x8x8xi1>
    %12 = vector.broadcast %8 : vector<2x1x8xi1> to vector<2x8x8xi1>
    %13 = arith.ori %11, %12 : vector<2x8x8xi1>
    %14 = vector.broadcast %9 : vector<1x8x8xi1> to vector<2x8x8xi1>
    %15 = arith.andi %14, %13 : vector<2x8x8xi1>
    %c0_5 = arith.constant 0 : index
    %c0_6 = arith.constant 0 : index
    %c0_7 = arith.constant 0 : index
    %16 = vector.load %arg3[%c0_5, %c0_6, %c0_7] : memref<2x1x32xf32, #tpu.memory_space<vmem>>, vector<1x1x32xf32>
    %17 = vector.shape_cast %16 : vector<1x1x32xf32> to vector<1x32xf32>
    %c0_8 = arith.constant 0 : index
    %c0_9 = arith.constant 0 : index
    %c0_10 = arith.constant 0 : index
    %18 = vector.load %arg4[%c0_8, %c0_9, %c0_10] : memref<2x1x32xf32, #tpu.memory_space<vmem>>, vector<1x1x32xf32>
    %19 = vector.shape_cast %18 : vector<1x1x32xf32> to vector<1x32xf32>
    %cst_11 = arith.constant dense<0.000000e+00> : vector<16xf32>
    %20 = vector.multi_reduction <add>, %1, %cst_11 [1] : vector<16x32xf32> to vector<16xf32>
    %21 = vector.shape_cast %20 : vector<16xf32> to vector<16x1xf32>
    %cst_12 = arith.constant 3.200000e+01 : f32
    %22 = vector.broadcast %cst_12 : f32 to vector<16x1xf32>
    %23 = arith.divf %21, %22 : vector<16x1xf32>
    %24 = vector.broadcast %23 : vector<16x1xf32> to vector<16x32xf32>
    %25 = arith.subf %1, %24 : vector<16x32xf32>
    %26 = arith.mulf %25, %25 : vector<16x32xf32>
    %cst_13 = arith.constant dense<0.000000e+00> : vector<16xf32>
    %27 = vector.multi_reduction <add>, %26, %cst_13 [1] : vector<16x32xf32> to vector<16xf32>
    %28 = vector.shape_cast %27 : vector<16xf32> to vector<16x1xf32>
    %cst_14 = arith.constant 3.200000e+01 : f32
    %29 = vector.broadcast %cst_14 : f32 to vector<16x1xf32>
    %30 = arith.divf %28, %29 : vector<16x1xf32>
    %31 = vector.broadcast %23 : vector<16x1xf32> to vector<16x32xf32>
    %32 = arith.subf %1, %31 : vector<16x32xf32>
    %cst_15 = arith.constant 9.99999974E-6 : f32
    %33 = vector.broadcast %cst_15 : f32 to vector<16x1xf32>
    %34 = arith.addf %30, %33 : vector<16x1xf32>
    %35 = math.rsqrt %34 : vector<16x1xf32>
    %36 = vector.broadcast %35 : vector<16x1xf32> to vector<16x32xf32>
    %37 = arith.mulf %32, %36 : vector<16x32xf32>
    %38 = vector.broadcast %17 : vector<1x32xf32> to vector<16x32xf32>
    %39 = arith.mulf %37, %38 : vector<16x32xf32>
    %40 = vector.broadcast %19 : vector<1x32xf32> to vector<16x32xf32>
    %41 = arith.addf %39, %40 : vector<16x32xf32>
    %42 = arith.truncf %41 : vector<16x32xf32> to vector<16x32xbf16>
    %c0_16 = arith.constant 0 : index
    %c0_17 = arith.constant 0 : index
    %c0_18 = arith.constant 0 : index
    %43 = vector.load %arg5[%c0_16, %c0_17, %c0_18] : memref<2x32x32xbf16, #tpu.memory_space<vmem>>, vector<1x32x32xbf16>
    %44 = vector.shape_cast %43 : vector<1x32x32xbf16> to vector<32x32xbf16>
    %cst_19 = arith.constant dense<0.000000e+00> : vector<16x32xf32>
    %45 = tpu.matmul %42, %44, %cst_19 {dimension_numbers = #tpu.dot_dimension_numbers<[1], [0], [0], [1], [0, 0, 1, 1], [], []>} : vector<16x32xbf16>, vector<32x32xbf16>, vector<16x32xf32> -> vector<16x32xf32>
    %c0_20 = arith.constant 0 : index
    %c0_21 = arith.constant 0 : index
    %c0_22 = arith.constant 0 : index
    %46 = vector.load %arg6[%c0_20, %c0_21, %c0_22] : memref<2x1x32xf32, #tpu.memory_space<vmem>>, vector<1x1x32xf32>
    %47 = vector.shape_cast %46 : vector<1x1x32xf32> to vector<1x32xf32>
    %48 = vector.broadcast %47 : vector<1x32xf32> to vector<16x32xf32>
    %49 = arith.addf %45, %48 : vector<16x32xf32>
    %c0_23 = arith.constant 0 : index
    %c0_24 = arith.constant 0 : index
    %c0_25 = arith.constant 0 : index
    %50 = vector.load %arg7[%c0_23, %c0_24, %c0_25] : memref<2x32x32xbf16, #tpu.memory_space<vmem>>, vector<1x32x32xbf16>
    %51 = vector.shape_cast %50 : vector<1x32x32xbf16> to vector<32x32xbf16>
    %cst_26 = arith.constant dense<0.000000e+00> : vector<16x32xf32>
    %52 = tpu.matmul %42, %51, %cst_26 {dimension_numbers = #tpu.dot_dimension_numbers<[1], [0], [0], [1], [0, 0, 1, 1], [], []>} : vector<16x32xbf16>, vector<32x32xbf16>, vector<16x32xf32> -> vector<16x32xf32>
    %c0_27 = arith.constant 0 : index
    %c0_28 = arith.constant 0 : index
    %c0_29 = arith.constant 0 : index
    %53 = vector.load %arg8[%c0_27, %c0_28, %c0_29] : memref<2x1x32xf32, #tpu.memory_space<vmem>>, vector<1x1x32xf32>
    %54 = vector.shape_cast %53 : vector<1x1x32xf32> to vector<1x32xf32>
    %55 = vector.broadcast %54 : vector<1x32xf32> to vector<16x32xf32>
    %56 = arith.addf %52, %55 : vector<16x32xf32>
    %c0_30 = arith.constant 0 : index
    %c0_31 = arith.constant 0 : index
    %c0_32 = arith.constant 0 : index
    %57 = vector.load %arg9[%c0_30, %c0_31, %c0_32] : memref<2x32x32xbf16, #tpu.memory_space<vmem>>, vector<1x32x32xbf16>
    %58 = vector.shape_cast %57 : vector<1x32x32xbf16> to vector<32x32xbf16>
    %cst_33 = arith.constant dense<0.000000e+00> : vector<16x32xf32>
    %59 = tpu.matmul %42, %58, %cst_33 {dimension_numbers = #tpu.dot_dimension_numbers<[1], [0], [0], [1], [0, 0, 1, 1], [], []>} : vector<16x32xbf16>, vector<32x32xbf16>, vector<16x32xf32> -> vector<16x32xf32>
    %c0_34 = arith.constant 0 : index
    %c0_35 = arith.constant 0 : index
    %c0_36 = arith.constant 0 : index
    %60 = vector.load %arg10[%c0_34, %c0_35, %c0_36] : memref<2x1x32xf32, #tpu.memory_space<vmem>>, vector<1x1x32xf32>
    %61 = vector.shape_cast %60 : vector<1x1x32xf32> to vector<1x32xf32>
    %62 = vector.broadcast %61 : vector<1x32xf32> to vector<16x32xf32>
    %63 = arith.addf %59, %62 : vector<16x32xf32>
    %64 = vector.shape_cast %49 : vector<16x32xf32> to vector<2x8x32xf32>
    %65 = arith.truncf %64 : vector<2x8x32xf32> to vector<2x8x32xbf16>
    %66 = vector.shape_cast %56 : vector<16x32xf32> to vector<2x8x32xf32>
    %67 = arith.truncf %66 : vector<2x8x32xf32> to vector<2x8x32xbf16>
    %68 = vector.shape_cast %63 : vector<16x32xf32> to vector<2x8x32xf32>
    %69 = arith.truncf %68 : vector<2x8x32xf32> to vector<2x8x32xbf16>
    "tpu.trace_start"() <{level = 10 : i32, message = "bqd,bkd->bqk"}> : () -> ()
    %cst_37 = arith.constant dense<0.000000e+00> : vector<2x8x8xf32>
    %70 = tpu.matmul %65, %67, %cst_37 {dimension_numbers = #tpu.dot_dimension_numbers<[2], [2], [1], [1], [0, 0, 0, 1, 1, 1], [0], [0]>} : vector<2x8x32xbf16>, vector<2x8x32xbf16>, vector<2x8x8xf32> -> vector<2x8x8xf32>
    %cst_38 = arith.constant -1.000000e+30 : f32
    "tpu.trace_stop"() : () -> ()
    %71 = vector.broadcast %cst_38 : f32 to vector<2x8x8xf32>
    %72 = arith.select %15, %71, %70 : vector<2x8x8xi1>, vector<2x8x8xf32>
    %cst_39 = arith.constant dense<0xFF800000> : vector<2x8xf32>
    %73 = vector.multi_reduction <maximumf>, %72, %cst_39 [2] : vector<2x8x8xf32> to vector<2x8xf32>
    %74 = vector.shape_cast %73 : vector<2x8xf32> to vector<2x8x1xf32>
    %75 = vector.broadcast %74 : vector<2x8x1xf32> to vector<2x8x8xf32>
    %76 = arith.subf %72, %75 : vector<2x8x8xf32>
    %77 = math.exp %76 : vector<2x8x8xf32>
    %cst_40 = arith.constant dense<0.000000e+00> : vector<2x8xf32>
    %78 = vector.multi_reduction <add>, %77, %cst_40 [2] : vector<2x8x8xf32> to vector<2x8xf32>
    %79 = vector.shape_cast %78 : vector<2x8xf32> to vector<2x8x1xf32>
    %80 = tpu.reciprocal %79 {approx = true} : vector<2x8x1xf32> -> vector<2x8x1xf32>
    %81 = vector.broadcast %80 : vector<2x8x1xf32> to vector<2x8x8xf32>
    %82 = arith.mulf %77, %81 : vector<2x8x8xf32>
    %83 = arith.truncf %82 : vector<2x8x8xf32> to vector<2x8x8xbf16>
    "tpu.trace_start"() <{level = 10 : i32, message = "bqk,bkd->bqd"}> : () -> ()
    %cst_41 = arith.constant dense<0.000000e+00> : vector<2x8x32xf32>
    %84 = tpu.matmul %83, %69, %cst_41 {dimension_numbers = #tpu.dot_dimension_numbers<[2], [1], [1], [2], [0, 0, 0, 1, 1, 2], [0], [0]>} : vector<2x8x8xbf16>, vector<2x8x32xbf16>, vector<2x8x32xf32> -> vector<2x8x32xf32>
    "tpu.trace_stop"() : () -> ()
    %85 = vector.shape_cast %84 : vector<2x8x32xf32> to vector<16x32xf32>
    %86 = arith.truncf %85 : vector<16x32xf32> to vector<16x32xbf16>
    %c0_42 = arith.constant 0 : index
    %c0_43 = arith.constant 0 : index
    %c0_44 = arith.constant 0 : index
    %87 = vector.load %arg11[%c0_42, %c0_43, %c0_44] : memref<2x32x32xbf16, #tpu.memory_space<vmem>>, vector<1x32x32xbf16>
    %88 = vector.shape_cast %87 : vector<1x32x32xbf16> to vector<32x32xbf16>
    %cst_45 = arith.constant dense<0.000000e+00> : vector<16x32xf32>
    %89 = tpu.matmul %86, %88, %cst_45 {dimension_numbers = #tpu.dot_dimension_numbers<[1], [0], [0], [1], [0, 0, 1, 1], [], []>} : vector<16x32xbf16>, vector<32x32xbf16>, vector<16x32xf32> -> vector<16x32xf32>
    %c0_46 = arith.constant 0 : index
    %c0_47 = arith.constant 0 : index
    %c0_48 = arith.constant 0 : index
    %90 = vector.load %arg12[%c0_46, %c0_47, %c0_48] : memref<2x1x32xf32, #tpu.memory_space<vmem>>, vector<1x1x32xf32>
    %91 = vector.shape_cast %90 : vector<1x1x32xf32> to vector<1x32xf32>
    %92 = vector.broadcast %91 : vector<1x32xf32> to vector<16x32xf32>
    %93 = arith.addf %89, %92 : vector<16x32xf32>
    %94 = arith.addf %1, %93 : vector<16x32xf32>
    %c0_49 = arith.constant 0 : index
    %c0_50 = arith.constant 0 : index
    %c0_51 = arith.constant 0 : index
    %95 = vector.load %arg13[%c0_49, %c0_50, %c0_51] : memref<2x1x32xf32, #tpu.memory_space<vmem>>, vector<1x1x32xf32>
    %96 = vector.shape_cast %95 : vector<1x1x32xf32> to vector<1x32xf32>
    %c0_52 = arith.constant 0 : index
    %c0_53 = arith.constant 0 : index
    %c0_54 = arith.constant 0 : index
    %97 = vector.load %arg14[%c0_52, %c0_53, %c0_54] : memref<2x1x32xf32, #tpu.memory_space<vmem>>, vector<1x1x32xf32>
    %98 = vector.shape_cast %97 : vector<1x1x32xf32> to vector<1x32xf32>
    %cst_55 = arith.constant dense<0.000000e+00> : vector<16xf32>
    %99 = vector.multi_reduction <add>, %94, %cst_55 [1] : vector<16x32xf32> to vector<16xf32>
    %100 = vector.shape_cast %99 : vector<16xf32> to vector<16x1xf32>
    %cst_56 = arith.constant 3.200000e+01 : f32
    %101 = vector.broadcast %cst_56 : f32 to vector<16x1xf32>
    %102 = arith.divf %100, %101 : vector<16x1xf32>
    %103 = vector.broadcast %102 : vector<16x1xf32> to vector<16x32xf32>
    %104 = arith.subf %94, %103 : vector<16x32xf32>
    %105 = arith.mulf %104, %104 : vector<16x32xf32>
    %cst_57 = arith.constant dense<0.000000e+00> : vector<16xf32>
    %106 = vector.multi_reduction <add>, %105, %cst_57 [1] : vector<16x32xf32> to vector<16xf32>
    %107 = vector.shape_cast %106 : vector<16xf32> to vector<16x1xf32>
    %cst_58 = arith.constant 3.200000e+01 : f32
    %108 = vector.broadcast %cst_58 : f32 to vector<16x1xf32>
    %109 = arith.divf %107, %108 : vector<16x1xf32>
    %110 = vector.broadcast %102 : vector<16x1xf32> to vector<16x32xf32>
    %111 = arith.subf %94, %110 : vector<16x32xf32>
    %cst_59 = arith.constant 9.99999974E-6 : f32
    %112 = vector.broadcast %cst_59 : f32 to vector<16x1xf32>
    %113 = arith.addf %109, %112 : vector<16x1xf32>
    %114 = math.rsqrt %113 : vector<16x1xf32>
    %115 = vector.broadcast %114 : vector<16x1xf32> to vector<16x32xf32>
    %116 = arith.mulf %111, %115 : vector<16x32xf32>
    %117 = vector.broadcast %96 : vector<1x32xf32> to vector<16x32xf32>
    %118 = arith.mulf %116, %117 : vector<16x32xf32>
    %119 = vector.broadcast %98 : vector<1x32xf32> to vector<16x32xf32>
    %120 = arith.addf %118, %119 : vector<16x32xf32>
    %121 = arith.truncf %120 : vector<16x32xf32> to vector<16x32xbf16>
    %c0_60 = arith.constant 0 : index
    %c0_61 = arith.constant 0 : index
    %c0_62 = arith.constant 0 : index
    %122 = vector.load %arg15[%c0_60, %c0_61, %c0_62] : memref<2x32x32xbf16, #tpu.memory_space<vmem>>, vector<1x32x32xbf16>
    %123 = vector.shape_cast %122 : vector<1x32x32xbf16> to vector<32x32xbf16>
    %cst_63 = arith.constant dense<0.000000e+00> : vector<16x32xf32>
    %124 = tpu.matmul %121, %123, %cst_63 {dimension_numbers = #tpu.dot_dimension_numbers<[1], [0], [0], [1], [0, 0, 1, 1], [], []>} : vector<16x32xbf16>, vector<32x32xbf16>, vector<16x32xf32> -> vector<16x32xf32>
    %c0_64 = arith.constant 0 : index
    %c0_65 = arith.constant 0 : index
    %c0_66 = arith.constant 0 : index
    %125 = vector.load %arg16[%c0_64, %c0_65, %c0_66] : memref<2x1x32xf32, #tpu.memory_space<vmem>>, vector<1x1x32xf32>
    %126 = vector.shape_cast %125 : vector<1x1x32xf32> to vector<1x32xf32>
    %127 = vector.broadcast %126 : vector<1x32xf32> to vector<16x32xf32>
    %128 = arith.addf %124, %127 : vector<16x32xf32>
    %cst_67 = arith.constant 0.000000e+00 : f32
    %129 = vector.broadcast %cst_67 : f32 to vector<16x32xf32>
    %130 = arith.maximumf %128, %129 : vector<16x32xf32>
    %131 = arith.truncf %130 : vector<16x32xf32> to vector<16x32xbf16>
    %c0_68 = arith.constant 0 : index
    %c0_69 = arith.constant 0 : index
    %c0_70 = arith.constant 0 : index
    %132 = vector.load %arg17[%c0_68, %c0_69, %c0_70] : memref<2x32x32xbf16, #tpu.memory_space<vmem>>, vector<1x32x32xbf16>
    %133 = vector.shape_cast %132 : vector<1x32x32xbf16> to vector<32x32xbf16>
    %cst_71 = arith.constant dense<0.000000e+00> : vector<16x32xf32>
    %134 = tpu.matmul %131, %133, %cst_71 {dimension_numbers = #tpu.dot_dimension_numbers<[1], [0], [0], [1], [0, 0, 1, 1], [], []>} : vector<16x32xbf16>, vector<32x32xbf16>, vector<16x32xf32> -> vector<16x32xf32>
    %c0_72 = arith.constant 0 : index
    %c0_73 = arith.constant 0 : index
    %c0_74 = arith.constant 0 : index
    %135 = vector.load %arg18[%c0_72, %c0_73, %c0_74] : memref<2x1x32xf32, #tpu.memory_space<vmem>>, vector<1x1x32xf32>
    %136 = vector.shape_cast %135 : vector<1x1x32xf32> to vector<1x32xf32>
    %137 = vector.broadcast %136 : vector<1x32xf32> to vector<16x32xf32>
    %138 = arith.addf %134, %137 : vector<16x32xf32>
    %139 = arith.addf %94, %138 : vector<16x32xf32>
    %c1 = arith.constant 1 : index
    %c0_75 = arith.constant 0 : index
    %c0_76 = arith.constant 0 : index
    %140 = vector.load %arg3[%c1, %c0_75, %c0_76] : memref<2x1x32xf32, #tpu.memory_space<vmem>>, vector<1x1x32xf32>
    %141 = vector.shape_cast %140 : vector<1x1x32xf32> to vector<1x32xf32>
    %c1_77 = arith.constant 1 : index
    %c0_78 = arith.constant 0 : index
    %c0_79 = arith.constant 0 : index
    %142 = vector.load %arg4[%c1_77, %c0_78, %c0_79] : memref<2x1x32xf32, #tpu.memory_space<vmem>>, vector<1x1x32xf32>
    %143 = vector.shape_cast %142 : vector<1x1x32xf32> to vector<1x32xf32>
    %cst_80 = arith.constant dense<0.000000e+00> : vector<16xf32>
    %144 = vector.multi_reduction <add>, %139, %cst_80 [1] : vector<16x32xf32> to vector<16xf32>
    %145 = vector.shape_cast %144 : vector<16xf32> to vector<16x1xf32>
    %cst_81 = arith.constant 3.200000e+01 : f32
    %146 = vector.broadcast %cst_81 : f32 to vector<16x1xf32>
    %147 = arith.divf %145, %146 : vector<16x1xf32>
    %148 = vector.broadcast %147 : vector<16x1xf32> to vector<16x32xf32>
    %149 = arith.subf %139, %148 : vector<16x32xf32>
    %150 = arith.mulf %149, %149 : vector<16x32xf32>
    %cst_82 = arith.constant dense<0.000000e+00> : vector<16xf32>
    %151 = vector.multi_reduction <add>, %150, %cst_82 [1] : vector<16x32xf32> to vector<16xf32>
    %152 = vector.shape_cast %151 : vector<16xf32> to vector<16x1xf32>
    %cst_83 = arith.constant 3.200000e+01 : f32
    %153 = vector.broadcast %cst_83 : f32 to vector<16x1xf32>
    %154 = arith.divf %152, %153 : vector<16x1xf32>
    %155 = vector.broadcast %147 : vector<16x1xf32> to vector<16x32xf32>
    %156 = arith.subf %139, %155 : vector<16x32xf32>
    %cst_84 = arith.constant 9.99999974E-6 : f32
    %157 = vector.broadcast %cst_84 : f32 to vector<16x1xf32>
    %158 = arith.addf %154, %157 : vector<16x1xf32>
    %159 = math.rsqrt %158 : vector<16x1xf32>
    %160 = vector.broadcast %159 : vector<16x1xf32> to vector<16x32xf32>
    %161 = arith.mulf %156, %160 : vector<16x32xf32>
    %162 = vector.broadcast %141 : vector<1x32xf32> to vector<16x32xf32>
    %163 = arith.mulf %161, %162 : vector<16x32xf32>
    %164 = vector.broadcast %143 : vector<1x32xf32> to vector<16x32xf32>
    %165 = arith.addf %163, %164 : vector<16x32xf32>
    %166 = arith.truncf %165 : vector<16x32xf32> to vector<16x32xbf16>
    %c1_85 = arith.constant 1 : index
    %c0_86 = arith.constant 0 : index
    %c0_87 = arith.constant 0 : index
    %167 = vector.load %arg5[%c1_85, %c0_86, %c0_87] : memref<2x32x32xbf16, #tpu.memory_space<vmem>>, vector<1x32x32xbf16>
    %168 = vector.shape_cast %167 : vector<1x32x32xbf16> to vector<32x32xbf16>
    %cst_88 = arith.constant dense<0.000000e+00> : vector<16x32xf32>
    %169 = tpu.matmul %166, %168, %cst_88 {dimension_numbers = #tpu.dot_dimension_numbers<[1], [0], [0], [1], [0, 0, 1, 1], [], []>} : vector<16x32xbf16>, vector<32x32xbf16>, vector<16x32xf32> -> vector<16x32xf32>
    %c1_89 = arith.constant 1 : index
    %c0_90 = arith.constant 0 : index
    %c0_91 = arith.constant 0 : index
    %170 = vector.load %arg6[%c1_89, %c0_90, %c0_91] : memref<2x1x32xf32, #tpu.memory_space<vmem>>, vector<1x1x32xf32>
    %171 = vector.shape_cast %170 : vector<1x1x32xf32> to vector<1x32xf32>
    %172 = vector.broadcast %171 : vector<1x32xf32> to vector<16x32xf32>
    %173 = arith.addf %169, %172 : vector<16x32xf32>
    %c1_92 = arith.constant 1 : index
    %c0_93 = arith.constant 0 : index
    %c0_94 = arith.constant 0 : index
    %174 = vector.load %arg7[%c1_92, %c0_93, %c0_94] : memref<2x32x32xbf16, #tpu.memory_space<vmem>>, vector<1x32x32xbf16>
    %175 = vector.shape_cast %174 : vector<1x32x32xbf16> to vector<32x32xbf16>
    %cst_95 = arith.constant dense<0.000000e+00> : vector<16x32xf32>
    %176 = tpu.matmul %166, %175, %cst_95 {dimension_numbers = #tpu.dot_dimension_numbers<[1], [0], [0], [1], [0, 0, 1, 1], [], []>} : vector<16x32xbf16>, vector<32x32xbf16>, vector<16x32xf32> -> vector<16x32xf32>
    %c1_96 = arith.constant 1 : index
    %c0_97 = arith.constant 0 : index
    %c0_98 = arith.constant 0 : index
    %177 = vector.load %arg8[%c1_96, %c0_97, %c0_98] : memref<2x1x32xf32, #tpu.memory_space<vmem>>, vector<1x1x32xf32>
    %178 = vector.shape_cast %177 : vector<1x1x32xf32> to vector<1x32xf32>
    %179 = vector.broadcast %178 : vector<1x32xf32> to vector<16x32xf32>
    %180 = arith.addf %176, %179 : vector<16x32xf32>
    %c1_99 = arith.constant 1 : index
    %c0_100 = arith.constant 0 : index
    %c0_101 = arith.constant 0 : index
    %181 = vector.load %arg9[%c1_99, %c0_100, %c0_101] : memref<2x32x32xbf16, #tpu.memory_space<vmem>>, vector<1x32x32xbf16>
    %182 = vector.shape_cast %181 : vector<1x32x32xbf16> to vector<32x32xbf16>
    %cst_102 = arith.constant dense<0.000000e+00> : vector<16x32xf32>
    %183 = tpu.matmul %166, %182, %cst_102 {dimension_numbers = #tpu.dot_dimension_numbers<[1], [0], [0], [1], [0, 0, 1, 1], [], []>} : vector<16x32xbf16>, vector<32x32xbf16>, vector<16x32xf32> -> vector<16x32xf32>
    %c1_103 = arith.constant 1 : index
    %c0_104 = arith.constant 0 : index
    %c0_105 = arith.constant 0 : index
    %184 = vector.load %arg10[%c1_103, %c0_104, %c0_105] : memref<2x1x32xf32, #tpu.memory_space<vmem>>, vector<1x1x32xf32>
    %185 = vector.shape_cast %184 : vector<1x1x32xf32> to vector<1x32xf32>
    %186 = vector.broadcast %185 : vector<1x32xf32> to vector<16x32xf32>
    %187 = arith.addf %183, %186 : vector<16x32xf32>
    %188 = vector.shape_cast %173 : vector<16x32xf32> to vector<2x8x32xf32>
    %189 = arith.truncf %188 : vector<2x8x32xf32> to vector<2x8x32xbf16>
    %190 = vector.shape_cast %180 : vector<16x32xf32> to vector<2x8x32xf32>
    %191 = arith.truncf %190 : vector<2x8x32xf32> to vector<2x8x32xbf16>
    %192 = vector.shape_cast %187 : vector<16x32xf32> to vector<2x8x32xf32>
    %193 = arith.truncf %192 : vector<2x8x32xf32> to vector<2x8x32xbf16>
    "tpu.trace_start"() <{level = 10 : i32, message = "bqd,bkd->bqk"}> : () -> ()
    %cst_106 = arith.constant dense<0.000000e+00> : vector<2x8x8xf32>
    %194 = tpu.matmul %189, %191, %cst_106 {dimension_numbers = #tpu.dot_dimension_numbers<[2], [2], [1], [1], [0, 0, 0, 1, 1, 1], [0], [0]>} : vector<2x8x32xbf16>, vector<2x8x32xbf16>, vector<2x8x8xf32> -> vector<2x8x8xf32>
    %cst_107 = arith.constant -1.000000e+30 : f32
    "tpu.trace_stop"() : () -> ()
    %195 = vector.broadcast %cst_107 : f32 to vector<2x8x8xf32>
    %196 = arith.select %15, %195, %194 : vector<2x8x8xi1>, vector<2x8x8xf32>
    %cst_108 = arith.constant dense<0xFF800000> : vector<2x8xf32>
    %197 = vector.multi_reduction <maximumf>, %196, %cst_108 [2] : vector<2x8x8xf32> to vector<2x8xf32>
    %198 = vector.shape_cast %197 : vector<2x8xf32> to vector<2x8x1xf32>
    %199 = vector.broadcast %198 : vector<2x8x1xf32> to vector<2x8x8xf32>
    %200 = arith.subf %196, %199 : vector<2x8x8xf32>
    %201 = math.exp %200 : vector<2x8x8xf32>
    %cst_109 = arith.constant dense<0.000000e+00> : vector<2x8xf32>
    %202 = vector.multi_reduction <add>, %201, %cst_109 [2] : vector<2x8x8xf32> to vector<2x8xf32>
    %203 = vector.shape_cast %202 : vector<2x8xf32> to vector<2x8x1xf32>
    %204 = tpu.reciprocal %203 {approx = true} : vector<2x8x1xf32> -> vector<2x8x1xf32>
    %205 = vector.broadcast %204 : vector<2x8x1xf32> to vector<2x8x8xf32>
    %206 = arith.mulf %201, %205 : vector<2x8x8xf32>
    %207 = arith.truncf %206 : vector<2x8x8xf32> to vector<2x8x8xbf16>
    "tpu.trace_start"() <{level = 10 : i32, message = "bqk,bkd->bqd"}> : () -> ()
    %cst_110 = arith.constant dense<0.000000e+00> : vector<2x8x32xf32>
    %208 = tpu.matmul %207, %193, %cst_110 {dimension_numbers = #tpu.dot_dimension_numbers<[2], [1], [1], [2], [0, 0, 0, 1, 1, 2], [0], [0]>} : vector<2x8x8xbf16>, vector<2x8x32xbf16>, vector<2x8x32xf32> -> vector<2x8x32xf32>
    "tpu.trace_stop"() : () -> ()
    %209 = vector.shape_cast %208 : vector<2x8x32xf32> to vector<16x32xf32>
    %210 = arith.truncf %209 : vector<16x32xf32> to vector<16x32xbf16>
    %c1_111 = arith.constant 1 : index
    %c0_112 = arith.constant 0 : index
    %c0_113 = arith.constant 0 : index
    %211 = vector.load %arg11[%c1_111, %c0_112, %c0_113] : memref<2x32x32xbf16, #tpu.memory_space<vmem>>, vector<1x32x32xbf16>
    %212 = vector.shape_cast %211 : vector<1x32x32xbf16> to vector<32x32xbf16>
    %cst_114 = arith.constant dense<0.000000e+00> : vector<16x32xf32>
    %213 = tpu.matmul %210, %212, %cst_114 {dimension_numbers = #tpu.dot_dimension_numbers<[1], [0], [0], [1], [0, 0, 1, 1], [], []>} : vector<16x32xbf16>, vector<32x32xbf16>, vector<16x32xf32> -> vector<16x32xf32>
    %c1_115 = arith.constant 1 : index
    %c0_116 = arith.constant 0 : index
    %c0_117 = arith.constant 0 : index
    %214 = vector.load %arg12[%c1_115, %c0_116, %c0_117] : memref<2x1x32xf32, #tpu.memory_space<vmem>>, vector<1x1x32xf32>
    %215 = vector.shape_cast %214 : vector<1x1x32xf32> to vector<1x32xf32>
    %216 = vector.broadcast %215 : vector<1x32xf32> to vector<16x32xf32>
    %217 = arith.addf %213, %216 : vector<16x32xf32>
    %218 = arith.addf %139, %217 : vector<16x32xf32>
    %c1_118 = arith.constant 1 : index
    %c0_119 = arith.constant 0 : index
    %c0_120 = arith.constant 0 : index
    %219 = vector.load %arg13[%c1_118, %c0_119, %c0_120] : memref<2x1x32xf32, #tpu.memory_space<vmem>>, vector<1x1x32xf32>
    %220 = vector.shape_cast %219 : vector<1x1x32xf32> to vector<1x32xf32>
    %c1_121 = arith.constant 1 : index
    %c0_122 = arith.constant 0 : index
    %c0_123 = arith.constant 0 : index
    %221 = vector.load %arg14[%c1_121, %c0_122, %c0_123] : memref<2x1x32xf32, #tpu.memory_space<vmem>>, vector<1x1x32xf32>
    %222 = vector.shape_cast %221 : vector<1x1x32xf32> to vector<1x32xf32>
    %cst_124 = arith.constant dense<0.000000e+00> : vector<16xf32>
    %223 = vector.multi_reduction <add>, %218, %cst_124 [1] : vector<16x32xf32> to vector<16xf32>
    %224 = vector.shape_cast %223 : vector<16xf32> to vector<16x1xf32>
    %cst_125 = arith.constant 3.200000e+01 : f32
    %225 = vector.broadcast %cst_125 : f32 to vector<16x1xf32>
    %226 = arith.divf %224, %225 : vector<16x1xf32>
    %227 = vector.broadcast %226 : vector<16x1xf32> to vector<16x32xf32>
    %228 = arith.subf %218, %227 : vector<16x32xf32>
    %229 = arith.mulf %228, %228 : vector<16x32xf32>
    %cst_126 = arith.constant dense<0.000000e+00> : vector<16xf32>
    %230 = vector.multi_reduction <add>, %229, %cst_126 [1] : vector<16x32xf32> to vector<16xf32>
    %231 = vector.shape_cast %230 : vector<16xf32> to vector<16x1xf32>
    %cst_127 = arith.constant 3.200000e+01 : f32
    %232 = vector.broadcast %cst_127 : f32 to vector<16x1xf32>
    %233 = arith.divf %231, %232 : vector<16x1xf32>
    %234 = vector.broadcast %226 : vector<16x1xf32> to vector<16x32xf32>
    %235 = arith.subf %218, %234 : vector<16x32xf32>
    %cst_128 = arith.constant 9.99999974E-6 : f32
    %236 = vector.broadcast %cst_128 : f32 to vector<16x1xf32>
    %237 = arith.addf %233, %236 : vector<16x1xf32>
    %238 = math.rsqrt %237 : vector<16x1xf32>
    %239 = vector.broadcast %238 : vector<16x1xf32> to vector<16x32xf32>
    %240 = arith.mulf %235, %239 : vector<16x32xf32>
    %241 = vector.broadcast %220 : vector<1x32xf32> to vector<16x32xf32>
    %242 = arith.mulf %240, %241 : vector<16x32xf32>
    %243 = vector.broadcast %222 : vector<1x32xf32> to vector<16x32xf32>
    %244 = arith.addf %242, %243 : vector<16x32xf32>
    %245 = arith.truncf %244 : vector<16x32xf32> to vector<16x32xbf16>
    %c1_129 = arith.constant 1 : index
    %c0_130 = arith.constant 0 : index
    %c0_131 = arith.constant 0 : index
    %246 = vector.load %arg15[%c1_129, %c0_130, %c0_131] : memref<2x32x32xbf16, #tpu.memory_space<vmem>>, vector<1x32x32xbf16>
    %247 = vector.shape_cast %246 : vector<1x32x32xbf16> to vector<32x32xbf16>
    %cst_132 = arith.constant dense<0.000000e+00> : vector<16x32xf32>
    %248 = tpu.matmul %245, %247, %cst_132 {dimension_numbers = #tpu.dot_dimension_numbers<[1], [0], [0], [1], [0, 0, 1, 1], [], []>} : vector<16x32xbf16>, vector<32x32xbf16>, vector<16x32xf32> -> vector<16x32xf32>
    %c1_133 = arith.constant 1 : index
    %c0_134 = arith.constant 0 : index
    %c0_135 = arith.constant 0 : index
    %249 = vector.load %arg16[%c1_133, %c0_134, %c0_135] : memref<2x1x32xf32, #tpu.memory_space<vmem>>, vector<1x1x32xf32>
    %250 = vector.shape_cast %249 : vector<1x1x32xf32> to vector<1x32xf32>
    %251 = vector.broadcast %250 : vector<1x32xf32> to vector<16x32xf32>
    %252 = arith.addf %248, %251 : vector<16x32xf32>
    %cst_136 = arith.constant 0.000000e+00 : f32
    %253 = vector.broadcast %cst_136 : f32 to vector<16x32xf32>
    %254 = arith.maximumf %252, %253 : vector<16x32xf32>
    %255 = arith.truncf %254 : vector<16x32xf32> to vector<16x32xbf16>
    %c1_137 = arith.constant 1 : index
    %c0_138 = arith.constant 0 : index
    %c0_139 = arith.constant 0 : index
    %256 = vector.load %arg17[%c1_137, %c0_138, %c0_139] : memref<2x32x32xbf16, #tpu.memory_space<vmem>>, vector<1x32x32xbf16>
    %257 = vector.shape_cast %256 : vector<1x32x32xbf16> to vector<32x32xbf16>
    %cst_140 = arith.constant dense<0.000000e+00> : vector<16x32xf32>
    %258 = tpu.matmul %255, %257, %cst_140 {dimension_numbers = #tpu.dot_dimension_numbers<[1], [0], [0], [1], [0, 0, 1, 1], [], []>} : vector<16x32xbf16>, vector<32x32xbf16>, vector<16x32xf32> -> vector<16x32xf32>
    %c1_141 = arith.constant 1 : index
    %c0_142 = arith.constant 0 : index
    %c0_143 = arith.constant 0 : index
    %259 = vector.load %arg18[%c1_141, %c0_142, %c0_143] : memref<2x1x32xf32, #tpu.memory_space<vmem>>, vector<1x1x32xf32>
    %260 = vector.shape_cast %259 : vector<1x1x32xf32> to vector<1x32xf32>
    %261 = vector.broadcast %260 : vector<1x32xf32> to vector<16x32xf32>
    %262 = arith.addf %258, %261 : vector<16x32xf32>
    %263 = arith.addf %218, %262 : vector<16x32xf32>
    %c0_144 = arith.constant 0 : index
    %c0_145 = arith.constant 0 : index
    %c0_146 = arith.constant 0 : index
    %264 = vector.load %arg19[%c0_144, %c0_145, %c0_146] : memref<1x1x32xf32, #tpu.memory_space<vmem>>, vector<1x1x32xf32>
    %265 = vector.shape_cast %264 : vector<1x1x32xf32> to vector<1x32xf32>
    %c0_147 = arith.constant 0 : index
    %c0_148 = arith.constant 0 : index
    %c0_149 = arith.constant 0 : index
    %266 = vector.load %arg20[%c0_147, %c0_148, %c0_149] : memref<1x1x32xf32, #tpu.memory_space<vmem>>, vector<1x1x32xf32>
    %267 = vector.shape_cast %266 : vector<1x1x32xf32> to vector<1x32xf32>
    %cst_150 = arith.constant dense<0.000000e+00> : vector<16xf32>
    %268 = vector.multi_reduction <add>, %263, %cst_150 [1] : vector<16x32xf32> to vector<16xf32>
    %269 = vector.shape_cast %268 : vector<16xf32> to vector<16x1xf32>
    %cst_151 = arith.constant 3.200000e+01 : f32
    %270 = vector.broadcast %cst_151 : f32 to vector<16x1xf32>
    %271 = arith.divf %269, %270 : vector<16x1xf32>
    %272 = vector.broadcast %271 : vector<16x1xf32> to vector<16x32xf32>
    %273 = arith.subf %263, %272 : vector<16x32xf32>
    %274 = arith.mulf %273, %273 : vector<16x32xf32>
    %cst_152 = arith.constant dense<0.000000e+00> : vector<16xf32>
    %275 = vector.multi_reduction <add>, %274, %cst_152 [1] : vector<16x32xf32> to vector<16xf32>
    %276 = vector.shape_cast %275 : vector<16xf32> to vector<16x1xf32>
    %cst_153 = arith.constant 3.200000e+01 : f32
    %277 = vector.broadcast %cst_153 : f32 to vector<16x1xf32>
    %278 = arith.divf %276, %277 : vector<16x1xf32>
    %279 = vector.broadcast %271 : vector<16x1xf32> to vector<16x32xf32>
    %280 = arith.subf %263, %279 : vector<16x32xf32>
    %cst_154 = arith.constant 9.99999974E-6 : f32
    %281 = vector.broadcast %cst_154 : f32 to vector<16x1xf32>
    %282 = arith.addf %278, %281 : vector<16x1xf32>
    %283 = math.rsqrt %282 : vector<16x1xf32>
    %284 = vector.broadcast %283 : vector<16x1xf32> to vector<16x32xf32>
    %285 = arith.mulf %280, %284 : vector<16x32xf32>
    %286 = vector.broadcast %265 : vector<1x32xf32> to vector<16x32xf32>
    %287 = arith.mulf %285, %286 : vector<16x32xf32>
    %288 = vector.broadcast %267 : vector<1x32xf32> to vector<16x32xf32>
    %289 = arith.addf %287, %288 : vector<16x32xf32>
    %290 = vector.shape_cast %289 : vector<16x32xf32> to vector<2x8x32xf32>
    %c0_155 = arith.constant 0 : index
    %c0_156 = arith.constant 0 : index
    %291 = vector.load %arg21[%c0_155, %c0_156] : memref<8x32xf32, #tpu.memory_space<vmem>>, vector<8x32xf32>
    %292 = vector.shape_cast %291 : vector<8x32xf32> to vector<1x8x32xf32>
    %293 = vector.broadcast %292 : vector<1x8x32xf32> to vector<2x8x32xf32>
    %294 = arith.mulf %290, %293 : vector<2x8x32xf32>
    %c0_157 = arith.constant 0 : index
    %c0_158 = arith.constant 0 : index
    %c0_159 = arith.constant 0 : index
    %295 = vector.load %arg22[%c0_157, %c0_158, %c0_159] : memref<2x8x32xf32, #tpu.memory_space<vmem>>, vector<2x8x32xf32>
    tpu.vector_store %arg22[%c0_157, %c0_158, %c0_159], %294 {strides = array<i32>} : memref<2x8x32xf32, #tpu.memory_space<vmem>>, vector<2x8x32xf32>,
    return
  }
  func.func @transform_0(%arg0: i32) -> (i32, i32, i32) {
    %c0_i32 = arith.constant 0 : i32
    %c0_i32_0 = arith.constant 0 : i32
    %c0_i32_1 = arith.constant 0 : i32
    return %arg0, %c0_i32, %c0_i32_0 : i32, i32, i32
  }
  func.func @transform_1(%arg0: i32) -> (i32, i32, i32) {
    %c0_i32 = arith.constant 0 : i32
    %c0_i32_0 = arith.constant 0 : i32
    %c0_i32_1 = arith.constant 0 : i32
    return %arg0, %c0_i32, %c0_i32_0 : i32, i32, i32
  }
  func.func @transform_2(%arg0: i32) -> (i32, i32, i32) {
    %c0_i32 = arith.constant 0 : i32
    %c0_i32_0 = arith.constant 0 : i32
    %c0_i32_1 = arith.constant 0 : i32
    %c0_i32_2 = arith.constant 0 : i32
    return %c0_i32, %c0_i32_0, %c0_i32_1 : i32, i32, i32
  }
  func.func @transform_3(%arg0: i32) -> (i32, i32, i32) {
    %c0_i32 = arith.constant 0 : i32
    %c0_i32_0 = arith.constant 0 : i32
    %c0_i32_1 = arith.constant 0 : i32
    %c0_i32_2 = arith.constant 0 : i32
    return %c0_i32, %c0_i32_0, %c0_i32_1 : i32, i32, i32
  }
  func.func @transform_4(%arg0: i32) -> (i32, i32, i32) {
    %c0_i32 = arith.constant 0 : i32
    %c0_i32_0 = arith.constant 0 : i32
    %c0_i32_1 = arith.constant 0 : i32
    %c0_i32_2 = arith.constant 0 : i32
    return %c0_i32, %c0_i32_0, %c0_i32_1 : i32, i32, i32
  }
  func.func @transform_5(%arg0: i32) -> (i32, i32, i32) {
    %c0_i32 = arith.constant 0 : i32
    %c0_i32_0 = arith.constant 0 : i32
    %c0_i32_1 = arith.constant 0 : i32
    %c0_i32_2 = arith.constant 0 : i32
    return %c0_i32, %c0_i32_0, %c0_i32_1 : i32, i32, i32
  }
  func.func @transform_6(%arg0: i32) -> (i32, i32, i32) {
    %c0_i32 = arith.constant 0 : i32
    %c0_i32_0 = arith.constant 0 : i32
    %c0_i32_1 = arith.constant 0 : i32
    %c0_i32_2 = arith.constant 0 : i32
    return %c0_i32, %c0_i32_0, %c0_i32_1 : i32, i32, i32
  }
  func.func @transform_7(%arg0: i32) -> (i32, i32, i32) {
    %c0_i32 = arith.constant 0 : i32
    %c0_i32_0 = arith.constant 0 : i32
    %c0_i32_1 = arith.constant 0 : i32
    %c0_i32_2 = arith.constant 0 : i32
    return %c0_i32, %c0_i32_0, %c0_i32_1 : i32, i32, i32
  }
  func.func @transform_8(%arg0: i32) -> (i32, i32, i32) {
    %c0_i32 = arith.constant 0 : i32
    %c0_i32_0 = arith.constant 0 : i32
    %c0_i32_1 = arith.constant 0 : i32
    %c0_i32_2 = arith.constant 0 : i32
    return %c0_i32, %c0_i32_0, %c0_i32_1 : i32, i32, i32
  }
  func.func @transform_9(%arg0: i32) -> (i32, i32, i32) {
    %c0_i32 = arith.constant 0 : i32
    %c0_i32_0 = arith.constant 0 : i32
    %c0_i32_1 = arith.constant 0 : i32
    %c0_i32_2 = arith.constant 0 : i32
    return %c0_i32, %c0_i32_0, %c0_i32_1 : i32, i32, i32
  }
  func.func @transform_10(%arg0: i32) -> (i32, i32, i32) {
    %c0_i32 = arith.constant 0 : i32
    %c0_i32_0 = arith.constant 0 : i32
    %c0_i32_1 = arith.constant 0 : i32
    %c0_i32_2 = arith.constant 0 : i32
    return %c0_i32, %c0_i32_0, %c0_i32_1 : i32, i32, i32
  }
  func.func @transform_11(%arg0: i32) -> (i32, i32, i32) {
    %c0_i32 = arith.constant 0 : i32
    %c0_i32_0 = arith.constant 0 : i32
    %c0_i32_1 = arith.constant 0 : i32
    %c0_i32_2 = arith.constant 0 : i32
    return %c0_i32, %c0_i32_0, %c0_i32_1 : i32, i32, i32
  }
  func.func @transform_12(%arg0: i32) -> (i32, i32, i32) {
    %c0_i32 = arith.constant 0 : i32
    %c0_i32_0 = arith.constant 0 : i32
    %c0_i32_1 = arith.constant 0 : i32
    %c0_i32_2 = arith.constant 0 : i32
    return %c0_i32, %c0_i32_0, %c0_i32_1 : i32, i32, i32
  }
  func.func @transform_13(%arg0: i32) -> (i32, i32, i32) {
    %c0_i32 = arith.constant 0 : i32
    %c0_i32_0 = arith.constant 0 : i32
    %c0_i32_1 = arith.constant 0 : i32
    %c0_i32_2 = arith.constant 0 : i32
    return %c0_i32, %c0_i32_0, %c0_i32_1 : i32, i32, i32
  }
  func.func @transform_14(%arg0: i32) -> (i32, i32, i32) {
    %c0_i32 = arith.constant 0 : i32
    %c0_i32_0 = arith.constant 0 : i32
    %c0_i32_1 = arith.constant 0 : i32
    %c0_i32_2 = arith.constant 0 : i32
    return %c0_i32, %c0_i32_0, %c0_i32_1 : i32, i32, i32
  }
  func.func @transform_15(%arg0: i32) -> (i32, i32, i32) {
    %c0_i32 = arith.constant 0 : i32
    %c0_i32_0 = arith.constant 0 : i32
    %c0_i32_1 = arith.constant 0 : i32
    %c0_i32_2 = arith.constant 0 : i32
    return %c0_i32, %c0_i32_0, %c0_i32_1 : i32, i32, i32
  }
  func.func @transform_16(%arg0: i32) -> (i32, i32, i32) {
    %c0_i32 = arith.constant 0 : i32
    %c0_i32_0 = arith.constant 0 : i32
    %c0_i32_1 = arith.constant 0 : i32
    %c0_i32_2 = arith.constant 0 : i32
    return %c0_i32, %c0_i32_0, %c0_i32_1 : i32, i32, i32
  }
  func.func @transform_17(%arg0: i32) -> (i32, i32, i32) {
    %c0_i32 = arith.constant 0 : i32
    %c0_i32_0 = arith.constant 0 : i32
    %c0_i32_1 = arith.constant 0 : i32
    %c0_i32_2 = arith.constant 0 : i32
    return %c0_i32, %c0_i32_0, %c0_i32_1 : i32, i32, i32
  }
  func.func @transform_18(%arg0: i32) -> (i32, i32, i32) {
    %c0_i32 = arith.constant 0 : i32
    %c0_i32_0 = arith.constant 0 : i32
    %c0_i32_1 = arith.constant 0 : i32
    %c0_i32_2 = arith.constant 0 : i32
    return %c0_i32, %c0_i32_0, %c0_i32_1 : i32, i32, i32
  }
  func.func @transform_19(%arg0: i32) -> (i32, i32, i32) {
    %c0_i32 = arith.constant 0 : i32
    %c0_i32_0 = arith.constant 0 : i32
    %c0_i32_1 = arith.constant 0 : i32
    %c0_i32_2 = arith.constant 0 : i32
    return %c0_i32, %c0_i32_0, %c0_i32_1 : i32, i32, i32
  }
  func.func @transform_20(%arg0: i32) -> (i32, i32) {
    %c0_i32 = arith.constant 0 : i32
    %c0_i32_0 = arith.constant 0 : i32
    %c0_i32_1 = arith.constant 0 : i32
    return %c0_i32, %c0_i32_0 : i32, i32
  }
  func.func @transform_21(%arg0: i32) -> (i32, i32, i32) {
    %c0_i32 = arith.constant 0 : i32
    %c0_i32_0 = arith.constant 0 : i32
    %c0_i32_1 = arith.constant 0 : i32
    return %arg0, %c0_i32, %c0_i32_0 : i32, i32, i32
  }
}

</mosaic_0001>

<bundles_post_ra>
// kernel: tpu_custom_call.1
= control target key start
LH: loop header
LB: loop body
LE: loop exit
PB: predicated region body
PF: predicated region fallthrough
CT: control target
= control target key end

     0   :  { %s3041_s0 = inlined_call_operand.hbm [shape: f32[2,8,32], index: 0, kind: input, shape index: {}]   ;;  %s3042_s1 = inlined_call_operand.hbm [shape: f32[2,1,8], index: 1, kind: input, shape index: {}]   ;;  %s3043_s2 = inlined_call_operand.hbm [shape: f32[2,1,32], index: 2, kind: input, shape index: {}]   ;;  %s3044_s3 = inlined_call_operand.hbm [shape: f32[2,1,32], index: 3, kind: input, shape index: {}]   ;;  %s3045_s4 = inlined_call_operand.hbm [shape: bf16[2,32,32], index: 4, kind: input, shape index: {}]   ;;  %s3046_s5 = inlined_call_operand.hbm [shape: f32[2,1,32], index: 5, kind: input, shape index: {}]   ;;  %s3047_s6 = inlined_call_operand.hbm [shape: bf16[2,32,32], index: 6, kind: input, shape index: {}]   ;;  %s3048_s7 = inlined_call_operand.hbm [shape: f32[2,1,32], index: 7, kind: input, shape index: {}]   ;;  %s3049_s8 = inlined_call_operand.hbm [shape: bf16[2,32,32], index: 8, kind: input, shape index: {}]   ;;  %s3050_s9 = inlined_call_operand.hbm [shape: f32[2,1,32], index: 9, kind: input, shape index: {}]   ;;  %s3051_s10 = inlined_call_operand.vmem [shape: bf16[2,32,32], index: 10, kind: input, shape index: {}]   ;;  %s3052_s11 = inlined_call_operand.hbm [shape: f32[2,1,32], index: 11, kind: input, shape index: {}]   ;;  %s3053_s12 = inlined_call_operand.vmem [shape: f32[2,1,32], index: 12, kind: input, shape index: {}]   ;;  %s3054_s13 = inlined_call_operand.vmem [shape: f32[2,1,32], index: 13, kind: input, shape index: {}]   ;;  %s3055_s14 = inlined_call_operand.hbm [shape: bf16[2,32,32], index: 14, kind: input, shape index: {}]   ;;  %s3056_s15 = inlined_call_operand.vmem [shape: f32[2,1,32], index: 15, kind: input, shape index: {}]   ;;  %s3057_s16 = inlined_call_operand.hbm [shape: bf16[2,32,32], index: 16, kind: input, shape index: {}]   ;;  %s3058_s17 = inlined_call_operand.vmem [shape: f32[2,1,32], index: 17, kind: input, shape index: {}]   ;;  %s3059_s18 = inlined_call_operand.vmem [shape: f32[1,1,32], index: 18, kind: input, shape index: {}]   ;;  %s3060_s19 = inlined_call_operand.vmem [shape: f32[1,1,32], index: 19, kind: input, shape index: {}]   ;;  %s3061_s20 = inlined_call_operand.vmem [shape: f32[8,32], index: 20, kind: input, shape index: {}]   ;;  %s3062_s21 = inlined_call_operand.hbm [shape: f32[2,8,32], index: 21, kind: output, shape index: {}]  }
   0x1   :  { %3072 = sst [smem:[#allocation32_spill]] %s3041_s0 }
   0x2   :  { %3073 = sst [smem:[#allocation33_spill]] %s3042_s1 }
   0x3   :  { %3074 = sst [smem:[#allocation34_spill]] %s3043_s2 }
   0x4   :  { %3075 = sst [smem:[#allocation35_spill]] %s3044_s3 }
   0x5   :  { %3076 = sst [smem:[#allocation36_spill]] %s3045_s4 }
   0x6   :  { %3077 = sst [smem:[#allocation37_spill]] %s3046_s5 }
   0x7   :  { %3078 = sst [smem:[#allocation38_spill]] %s3060_s19 }
   0x8   :  { %3079 = sst [smem:[#allocation39_spill]] %s3061_s20 }
   0x9   :  { %3080 = sst [smem:[#allocation40_spill]] %s3062_s21 }
   0xa   :  { %26 = vsyncpa [#allocation3], 0 }
   0xb   :  { %27 = vsyncpa [#allocation6], 0 }
   0xc   :  { %28 = vsyncpa [#allocation9], 0 }
   0xd   :  { %29 = vsyncpa [#allocation12], 0 }
   0xe   :  { %30 = vsyncpa [#allocation15], 0 }
   0xf   :  { %31 = vsyncpa [#allocation18], 0 }
  0x10   :  { %32 = vsyncpa [#allocation21], 0 }
  0x11   :  { %33 = vsyncpa [#allocation4], 0  ;;  %s2467_s2 = smov [#allocation5]   ;;  %s3081_s3 = sld [smem:[#allocation33_spill]] }
  0x12   :  { %s51_s25 = sshll.u32 %s2467_s2, 4  ;;  %s52_s25 = int_to_ptr.vmem [resolvable:$true] %s51_s25 }
  0x17   :  { %s2143_s28 = scalar_lea.hbm %s3081_s3, 32 }
  0x18   :  { %p2144_p0 = scmp.ne.s32.totalorder %s3081_s3, %s2143_s28  ;;  %p2147_p1 = scmp.lt.u32.totalorder %s2143_s28, %s3081_s3 }
  0x1a   :  { %p2149_p2 = pnand %p2147_p1, %p2144_p0 }
  0x1c   :  { %2152 = shalt.err (!%p2149_p2)
}
  0x1d   :  { %s2153_s5 = scalar_lea.vmem %s52_s25, 32  ;;  %p2158_p4 = scmp.lt.s32.totalorder %s52_s25, %s52_s25 }
  0x1e   :  { %p2154_p3 = scmp.ne.s32.totalorder %s52_s25, %s2153_s5  ;;  %p2159_p5 = scmp.lt.s32.totalorder %s2153_s5, %s2153_s5 }
  0x20   :  { %p2160_p6 = por %p2159_p5, %p2158_p4 }
  0x22   :  { %p2161_p7 = pnand %p2160_p6, %p2154_p3 }
  0x24   :  { %2164 = shalt.err (!%p2161_p7)
}
  0x25   :  { %s2468_s22 = smov 16   ;;  %s2469_s23 = smov 1  }
  0x26   :  { %57 = dma.hbm_to_vmem [thread:$0]  %s3081_s3, 32, %s52_s25, [#allocation6], %s2468_s22, %s2468_s22, %s2469_s23  }
  0x27   :  { %s2470_s2 = smov [#allocation8]   ;;  %s2471_s27 = smov [#allocation11]  }
  0x28   :  { %s75_s26 = sshll.u32 %s2470_s2, 4  ;;  %s99_s28 = sshll.u32 %s2471_s27, 4  ;;  %s76_s26 = int_to_ptr.vmem [resolvable:$true] %s75_s26  ;;  %s100_s28 = int_to_ptr.vmem [resolvable:$true] %s99_s28 }
  0x29   :  { %s3082_s4 = sld [smem:[#allocation35_spill]] }
  0x2f   :  { %s2165_s30 = scalar_lea.hbm %s3082_s4, 32 }
  0x30   :  { %p2166_p8 = scmp.ne.s32.totalorder %s3082_s4, %s2165_s30  ;;  %p2169_p9 = scmp.lt.u32.totalorder %s2165_s30, %s3082_s4 }
  0x32   :  { %p2171_p10 = pnand %p2169_p9, %p2166_p8 }
  0x34   :  { %2174 = shalt.err (!%p2171_p10)
}
  0x35   :  { %s2175_s25 = scalar_lea.vmem %s76_s26, 32  ;;  %p2180_p12 = scmp.lt.s32.totalorder %s76_s26, %s76_s26 }
  0x36   :  { %p2176_p11 = scmp.ne.s32.totalorder %s76_s26, %s2175_s25  ;;  %p2181_p13 = scmp.lt.s32.totalorder %s2175_s25, %s2175_s25 }
  0x38   :  { %p2182_p0 = por %p2181_p13, %p2180_p12 }
  0x3a   :  { %p2183_p1 = pnand %p2182_p0, %p2176_p11 }
  0x3c   :  { %2186 = shalt.err (!%p2183_p1)
}
  0x3d   :  { %81 = dma.hbm_to_vmem [thread:$0]  %s3082_s4, 32, %s76_s26, [#allocation9], %s2468_s22, %s2468_s22, %s2469_s23  }
  0x3e   :  { %s3083_s20 = sld [smem:[#allocation37_spill]] }
  0x44   :  { %s2187_s24 = scalar_lea.hbm %s3083_s20, 32 }
  0x45   :  { %p2188_p2 = scmp.ne.s32.totalorder %s3083_s20, %s2187_s24  ;;  %p2191_p3 = scmp.lt.u32.totalorder %s2187_s24, %s3083_s20 }
  0x47   :  { %p2193_p4 = pnand %p2191_p3, %p2188_p2 }
  0x49   :  { %2196 = shalt.err (!%p2193_p4)
}
  0x4a   :  { %s2197_s30 = scalar_lea.vmem %s100_s28, 32  ;;  %p2202_p6 = scmp.lt.s32.totalorder %s100_s28, %s100_s28 }
  0x4b   :  { %p2198_p5 = scmp.ne.s32.totalorder %s100_s28, %s2197_s30  ;;  %p2203_p7 = scmp.lt.s32.totalorder %s2197_s30, %s2197_s30 }
  0x4d   :  { %p2204_p8 = por %p2203_p7, %p2202_p6 }
  0x4f   :  { %p2205_p9 = pnand %p2204_p8, %p2198_p5 }
  0x51   :  { %2208 = shalt.err (!%p2205_p9)
}
  0x52   :  { %105 = dma.hbm_to_vmem [thread:$0]  %s3083_s20, 32, %s100_s28, [#allocation12], %s2468_s22, %s2468_s22, %s2469_s23  }
  0x53   :  { %s2472_s5 = smov [#allocation14]   ;;  %s2473_s3 = smov [#allocation17]  }
  0x54   :  { %s123_s25 = sshll.u32 %s2472_s5, 4  ;;  %s147_s1 = sshll.u32 %s2473_s3, 4  ;;  %s124_s25 = int_to_ptr.vmem [resolvable:$true] %s123_s25  ;;  %s148_s1 = int_to_ptr.vmem [resolvable:$true] %s147_s1 }
  0x55   :  { %s2209_s24 = scalar_lea.hbm %s3048_s7, 32 }
  0x56   :  { %p2210_p10 = scmp.ne.s32.totalorder %s3048_s7, %s2209_s24  ;;  %p2213_p11 = scmp.lt.u32.totalorder %s2209_s24, %s3048_s7 }
  0x58   :  { %p2215_p12 = pnand %p2213_p11, %p2210_p10 }
  0x5a   :  { %2218 = shalt.err (!%p2215_p12)
}
  0x5b   :  { %s2219_s28 = scalar_lea.vmem %s124_s25, 32  ;;  %p2224_p0 = scmp.lt.s32.totalorder %s124_s25, %s124_s25 }
  0x5c   :  { %p2220_p13 = scmp.ne.s32.totalorder %s124_s25, %s2219_s28  ;;  %p2225_p1 = scmp.lt.s32.totalorder %s2219_s28, %s2219_s28 }
  0x5e   :  { %p2226_p2 = por %p2225_p1, %p2224_p0 }
  0x60   :  { %p2227_p3 = pnand %p2226_p2, %p2220_p13 }
  0x62   :  { %2230 = shalt.err (!%p2227_p3)
}
  0x63   :  { %129 = dma.hbm_to_vmem [thread:$0]  %s3048_s7, 32, %s124_s25, [#allocation15], %s2468_s22, %s2468_s22, %s2469_s23  }
  0x64   :  { %s2231_s5 = scalar_lea.hbm %s3050_s9, 32 }
  0x65   :  { %p2232_p4 = scmp.ne.s32.totalorder %s3050_s9, %s2231_s5  ;;  %p2235_p5 = scmp.lt.u32.totalorder %s2231_s5, %s3050_s9 }
  0x67   :  { %p2237_p6 = pnand %p2235_p5, %p2232_p4 }
  0x69   :  { %2240 = shalt.err (!%p2237_p6)
}
  0x6a   :  { %s2241_s2 = scalar_lea.vmem %s148_s1, 32  ;;  %p2246_p8 = scmp.lt.s32.totalorder %s148_s1, %s148_s1 }
  0x6b   :  { %p2242_p7 = scmp.ne.s32.totalorder %s148_s1, %s2241_s2  ;;  %p2247_p9 = scmp.lt.s32.totalorder %s2241_s2, %s2241_s2 }
  0x6d   :  { %p2248_p10 = por %p2247_p9, %p2246_p8 }
  0x6f   :  { %p2249_p11 = pnand %p2248_p10, %p2242_p7 }
  0x71   :  { %2252 = shalt.err (!%p2249_p11)
}
  0x72   :  { %153 = dma.hbm_to_vmem [thread:$0]  %s3050_s9, 32, %s148_s1, [#allocation18], %s2468_s22, %s2468_s22, %s2469_s23  }
  0x73   :  { %s2474_s27 = smov [#allocation20]   ;;  %s2475_s0 = smov [#allocation2]  }
  0x74   :  { %s177_s29 = sshll.u32 %s2474_s27, 4  ;;  %s39_s28 = sshll.u32 %s2475_s0, 4  ;;  %s178_s29 = int_to_ptr.vmem [resolvable:$true] %s177_s29  ;;  %s40_s28 = int_to_ptr.vmem [resolvable:$true] %s39_s28 }
  0x75   :  { %s2253_s26 = scalar_lea.hbm %s3055_s14, 512 }
  0x76   :  { %p2254_p12 = scmp.ne.s32.totalorder %s3055_s14, %s2253_s26  ;;  %p2257_p13 = scmp.lt.u32.totalorder %s2253_s26, %s3055_s14 }
  0x78   :  { %p2259_p0 = pnand %p2257_p13, %p2254_p12 }
  0x7a   :  { %2262 = shalt.err (!%p2259_p0)
}
  0x7b   :  { %s2263_s9 = scalar_lea.vmem %s178_s29, 512  ;;  %p2268_p2 = scmp.lt.s32.totalorder %s178_s29, %s178_s29 }
  0x7c   :  { %p2264_p1 = scmp.ne.s32.totalorder %s178_s29, %s2263_s9  ;;  %p2269_p3 = scmp.lt.s32.totalorder %s2263_s9, %s2263_s9 }
  0x7e   :  { %p2270_p4 = por %p2269_p3, %p2268_p2 }
  0x80   :  { %p2271_p5 = pnand %p2270_p4, %p2264_p1 }
  0x82   :  { %2274 = shalt.err (!%p2271_p5)
}
  0x83   :  { %s3070_s1 = smov 64   ;;  %s2477_s19 = smov 4  }
  0x84   :  { %183 = dma.hbm_to_vmem [thread:$0]  %s3055_s14, 512, %s178_s29, [#allocation21], %s3070_s1, %s3070_s1, %s2477_s19  }
  0x85   :  { %s3084_s27 = sld [smem:[#allocation32_spill]] }
  0x8b   :  { %s2275_s0 = scalar_lea.hbm %s3084_s27, 256 }
  0x8c   :  { %p2276_p6 = scmp.ne.s32.totalorder %s3084_s27, %s2275_s0  ;;  %p2279_p7 = scmp.lt.u32.totalorder %s2275_s0, %s3084_s27 }
  0x8e   :  { %p2281_p8 = pnand %p2279_p7, %p2276_p6 }
  0x90   :  { %2284 = shalt.err (!%p2281_p8)
}
  0x91   :  { %s2285_s5 = scalar_lea.vmem %s40_s28, 256  ;;  %p2290_p10 = scmp.lt.s32.totalorder %s40_s28, %s40_s28 }
  0x92   :  { %p2286_p9 = scmp.ne.s32.totalorder %s40_s28, %s2285_s5  ;;  %p2291_p11 = scmp.lt.s32.totalorder %s2285_s5, %s2285_s5 }
  0x94   :  { %p2292_p12 = por %p2291_p11, %p2290_p10 }
  0x96   :  { %p2293_p13 = pnand %p2292_p12, %p2286_p9 }
  0x98   :  { %2296 = shalt.err (!%p2293_p13)
}
  0x99   :  { %s2478_s14 = smov 128   ;;  %s2479_s29 = smov 8  }
  0x9a   :  { %45 = dma.hbm_to_vmem [thread:$0]  %s3084_s27, 256, %s40_s28, [#allocation3], %s2478_s14, %s2478_s14, %s2479_s29  }
  0x9b   :  { %s2480_s9 = smov [#allocation7]   ;;  %s2481_s2 = smov [#allocation10]  }
  0x9c   :  { %s63_s24 = sshll.u32 %s2480_s9, 4  ;;  %s87_s7 = sshll.u32 %s2481_s2, 4  ;;  %s64_s24 = int_to_ptr.vmem [resolvable:$true] %s63_s24  ;;  %s88_s7 = int_to_ptr.vmem [resolvable:$true] %s87_s7 }
  0x9d   :  { %s3085_s20 = sld [smem:[#allocation34_spill]] }
  0xa3   :  { %s2297_s30 = scalar_lea.hbm %s3085_s20, 32 }
  0xa4   :  { %p2298_p0 = scmp.ne.s32.totalorder %s3085_s20, %s2297_s30  ;;  %p2301_p1 = scmp.lt.u32.totalorder %s2297_s30, %s3085_s20 }
  0xa6   :  { %p2303_p2 = pnand %p2301_p1, %p2298_p0 }
  0xa8   :  { %2306 = shalt.err (!%p2303_p2)
}
  0xa9   :  { %s2307_s28 = scalar_lea.vmem %s64_s24, 32  ;;  %p2312_p4 = scmp.lt.s32.totalorder %s64_s24, %s64_s24 }
  0xaa   :  { %p2308_p3 = scmp.ne.s32.totalorder %s64_s24, %s2307_s28  ;;  %p2313_p5 = scmp.lt.s32.totalorder %s2307_s28, %s2307_s28 }
  0xac   :  { %p2314_p6 = por %p2313_p5, %p2312_p4 }
  0xae   :  { %p2315_p7 = pnand %p2314_p6, %p2308_p3 }
  0xb0   :  { %2318 = shalt.err (!%p2315_p7)
}
  0xb1   :  { %69 = dma.hbm_to_vmem [thread:$0]  %s3085_s20, 32, %s64_s24, [#allocation6], %s2468_s22, %s2468_s22, %s2469_s23  }
  0xb2   :  { %s3086_s9 = sld [smem:[#allocation36_spill]] }
  0xb8   :  { %s2319_s2 = scalar_lea.hbm %s3086_s9, 512 }
  0xb9   :  { %p2320_p8 = scmp.ne.s32.totalorder %s3086_s9, %s2319_s2  ;;  %p2323_p9 = scmp.lt.u32.totalorder %s2319_s2, %s3086_s9 }
  0xbb   :  { %p2325_p10 = pnand %p2323_p9, %p2320_p8 }
  0xbd   :  { %2328 = shalt.err (!%p2325_p10)
}
  0xbe   :  { %s2329_s4 = scalar_lea.vmem %s88_s7, 512  ;;  %p2334_p12 = scmp.lt.s32.totalorder %s88_s7, %s88_s7 }
  0xbf   :  { %p2330_p11 = scmp.ne.s32.totalorder %s88_s7, %s2329_s4  ;;  %p2335_p13 = scmp.lt.s32.totalorder %s2329_s4, %s2329_s4 }
  0xc1   :  { %p2336_p0 = por %p2335_p13, %p2334_p12 }
  0xc3   :  { %p2337_p1 = pnand %p2336_p0, %p2330_p11 }
  0xc5   :  { %2340 = shalt.err (!%p2337_p1)
}
  0xc6   :  { %s3087_s24 = smov 64   ;;  %s2482_s28 = smov [#allocation13]  }
  0xc7   :  { %93 = dma.hbm_to_vmem [thread:$0]  %s3086_s9, 512, %s88_s7, [#allocation9], %s3087_s24, %s3087_s24, %s2477_s19  }
  0xc8   :  { %s111_s27 = sshll.u32 %s2482_s28, 4  ;;  %s2483_s3 = smov [#allocation16]   ;;  %s112_s27 = int_to_ptr.vmem [resolvable:$true] %s111_s27 }
  0xc9   :  { %s135_s21 = sshll.u32 %s2483_s3, 4  ;;  %s2341_s25 = scalar_lea.hbm %s3047_s6, 512  ;;  %s136_s21 = int_to_ptr.vmem [resolvable:$true] %s135_s21 }
  0xca   :  { %p2342_p2 = scmp.ne.s32.totalorder %s3047_s6, %s2341_s25  ;;  %p2345_p3 = scmp.lt.u32.totalorder %s2341_s25, %s3047_s6 }
  0xcc   :  { %p2347_p4 = pnand %p2345_p3, %p2342_p2 }
  0xce   :  { %2350 = shalt.err (!%p2347_p4)
}
  0xcf   :  { %s2351_s7 = scalar_lea.vmem %s112_s27, 512  ;;  %p2356_p6 = scmp.lt.s32.totalorder %s112_s27, %s112_s27 }
  0xd0   :  { %p2352_p5 = scmp.ne.s32.totalorder %s112_s27, %s2351_s7  ;;  %p2357_p7 = scmp.lt.s32.totalorder %s2351_s7, %s2351_s7 }
  0xd2   :  { %p2358_p8 = por %p2357_p7, %p2356_p6 }
  0xd4   :  { %p2359_p9 = pnand %p2358_p8, %p2352_p5 }
  0xd6   :  { %2362 = shalt.err (!%p2359_p9)
}
  0xd7   :  { %117 = dma.hbm_to_vmem [thread:$0]  %s3047_s6, 512, %s112_s27, [#allocation12], %s3087_s24, %s3087_s24, %s2477_s19  }
  0xd8   :  { %s2363_s3 = scalar_lea.hbm %s3049_s8, 512 }
  0xd9   :  { %p2364_p10 = scmp.ne.s32.totalorder %s3049_s8, %s2363_s3  ;;  %p2367_p11 = scmp.lt.u32.totalorder %s2363_s3, %s3049_s8 }
  0xdb   :  { %p2369_p12 = pnand %p2367_p11, %p2364_p10 }
  0xdd   :  { %2372 = shalt.err (!%p2369_p12)
}
  0xde   :  { %s2373_s30 = scalar_lea.vmem %s136_s21, 512  ;;  %p2378_p0 = scmp.lt.s32.totalorder %s136_s21, %s136_s21 }
  0xdf   :  { %p2374_p13 = scmp.ne.s32.totalorder %s136_s21, %s2373_s30  ;;  %p2379_p1 = scmp.lt.s32.totalorder %s2373_s30, %s2373_s30 }
  0xe1   :  { %p2380_p2 = por %p2379_p1, %p2378_p0 }
  0xe3   :  { %p2381_p3 = pnand %p2380_p2, %p2374_p13 }
  0xe5   :  { %2384 = shalt.err (!%p2381_p3)
}
  0xe6   :  { %141 = dma.hbm_to_vmem [thread:$0]  %s3049_s8, 512, %s136_s21, [#allocation15], %s3087_s24, %s3087_s24, %s2477_s19  }
  0xe7   :  { %s2484_s26 = smov [#allocation19]   ;;  %s2485_s7 = smov [#allocation22]  }
  0xe8   :  { %s161_s4 = sshll.u32 %s2484_s26, 4  ;;  %s191_s9 = sshll.u32 %s2485_s7, 4  ;;  %s162_s4 = int_to_ptr.vmem [resolvable:$true] %s161_s4  ;;  %s192_s9 = int_to_ptr.vmem [resolvable:$true] %s191_s9 }
  0xe9   :  { %s2385_s28 = scalar_lea.hbm %s3052_s11, 32 }
  0xea   :  { %p2386_p4 = scmp.ne.s32.totalorder %s3052_s11, %s2385_s28  ;;  %p2389_p5 = scmp.lt.u32.totalorder %s2385_s28, %s3052_s11 }
  0xec   :  { %p2391_p6 = pnand %p2389_p5, %p2386_p4 }
  0xee   :  { %2394 = shalt.err (!%p2391_p6)
}
  0xef   :  { %s2395_s8 = scalar_lea.vmem %s162_s4, 32  ;;  %p2400_p8 = scmp.lt.s32.totalorder %s162_s4, %s162_s4 }
  0xf0   :  { %p2396_p7 = scmp.ne.s32.totalorder %s162_s4, %s2395_s8  ;;  %p2401_p9 = scmp.lt.s32.totalorder %s2395_s8, %s2395_s8 }
  0xf2   :  { %p2402_p10 = por %p2401_p9, %p2400_p8 }
  0xf4   :  { %p2403_p11 = pnand %p2402_p10, %p2396_p7 }
  0xf6   :  { %2406 = shalt.err (!%p2403_p11)
}
  0xf7   :  { %167 = dma.hbm_to_vmem [thread:$0]  %s3052_s11, 32, %s162_s4, [#allocation18], %s2468_s22, %s2468_s22, %s2469_s23  }
  0xf8   :  { %s2407_s27 = scalar_lea.hbm %s3057_s16, 512 }
  0xf9   :  { %p2408_p12 = scmp.ne.s32.totalorder %s3057_s16, %s2407_s27  ;;  %p2411_p13 = scmp.lt.u32.totalorder %s2407_s27, %s3057_s16 }
  0xfb   :  { %p2413_p0 = pnand %p2411_p13, %p2408_p12 }
  0xfd   :  { %2416 = shalt.err (!%p2413_p0)
}
  0xfe   :  { %s2417_s28 = scalar_lea.vmem %s192_s9, 512  ;;  %p2422_p2 = scmp.lt.s32.totalorder %s192_s9, %s192_s9 }
  0xff   :  { %p2418_p1 = scmp.ne.s32.totalorder %s192_s9, %s2417_s28  ;;  %p2423_p3 = scmp.lt.s32.totalorder %s2417_s28, %s2417_s28 }
 0x101   :  { %p2424_p4 = por %p2423_p3, %p2422_p2 }
 0x103   :  { %p2425_p5 = pnand %p2424_p4, %p2418_p1 }
 0x105   :  { %2428 = shalt.err (!%p2425_p5)
}
 0x106   :  { %197 = dma.hbm_to_vmem [thread:$0]  %s3057_s16, 512, %s192_s9, [#allocation21], %s3087_s24, %s3087_s24, %s2477_s19  }
 0x107   :  { %2451 = dma.done.wait [#allocation3], 256  }
 0x108   :  { %2452 = vsyncadd [#allocation3], 4294967040 }
 0x109   :  { %2453 = dma.done.wait [#allocation6], 64  }
 0x10a   :  { %2454 = vsyncadd [#allocation6], 4294967232 }
 0x10b   :  { %2455 = dma.done.wait [#allocation9], 544  }
 0x10c   :  { %2456 = vsyncadd [#allocation9], 4294966752 }
 0x10d   :  { %2457 = dma.done.wait [#allocation12], 544  }
 0x10e   :  { %2458 = vsyncadd [#allocation12], 4294966752 }
 0x10f   :  { %2459 = dma.done.wait [#allocation15], 544  }
 0x110   :  { %2460 = vsyncadd [#allocation15], 4294966752 }
 0x111   :  { %2461 = dma.done.wait [#allocation18], 64  }
 0x112   :  { %2462 = vsyncadd [#allocation18], 4294967232 }
 0x113   :  { %2463 = dma.done.wait [#allocation21], 1024  }
 0x114   :  { %2464 = vsyncadd [#allocation21], 4294966272  ;;  %vm280_vm0 = vcmask 261120   ;;  %v2795_v0 = vld [vmem:[#allocation2] sm:$0xff]  ;;  %v2797_v1 = vld [vmem:[#allocation2 + $0x8] sm:$0xff]  ;;  %v2486_v16 = vmov 0.0  }
 0x115   :  { %v281_v2 = vsel %vm280_vm0, %v2795_v0, 0.0  ;;  %v284_v3 = vsel %vm280_vm0, %v2797_v1, 0.0  ;;  %v2083_v14 = vld [vmem:[#allocation10] sm:$0xff]   ;;  %1916 = vmatprep.subr.bf16.mxu0 %v2486_v16  ;;  %1924 = vmatprep.subr.bf16.mxu1 %v2486_v16  ;;  %v2085_v17 = vld [vmem:[#allocation10 + $0x8] sm:$0xff]   ;;  %vm2487_vm1 = vmmov 0   ;;  %vm648_vm2 = vcmask 1043456  }
 0x116   :  { %282 = vadd.xlane.f32.xlu0 %v281_v2  ;;  %v2084_v15 = vld [vmem:[#allocation13] sm:$0xff]   ;;  %1917 = vmatpush3.bf16.msra.mxu0 %v2083_v14  ;;  %v2086_v18 = vld [vmem:[#allocation13 + $0x8] sm:$0xff]   ;;  %v1790_v27 = vld [vmem:[#allocation7] ss:$0 sm:$0xff]  ;;  %vm620_vm12 = vcmask 64512   ;;  %s3092_s16 = sld [smem:[#allocation38_spill]] }
 0x117   :  { %1925 = vmatpush3.bf16.msra.mxu1 %v2084_v15  ;;  %1918 = vmatprep.subr.bf16.mxu0 %v2486_v16  ;;  %v1791_v31 = vld [vmem:[#allocation8] ss:$0 sm:$0xff]  ;;  %v2087_v35 = vld [vmem:[#allocation16] sm:$0xff]   ;;  %v2088_v37 = vld [vmem:[#allocation16 + $0x8] sm:$0xff]   ;;  %s3093_s24 = sld [smem:[#allocation39_spill]]  ;;  %s2489_s4 = smov [#allocation23]  }
 0x118   :  { %1926 = vmatprep.subr.bf16.mxu1 %v2486_v16  ;;  %1920 = vmatprep.mubr.msk.bf16.mxu0 %vm2487_vm1, %v2486_v16  ;;  %v1796_v38 = vld [vmem:[#allocation14] ss:$0 sm:$0xff]  ;;  %v1792_v50 = vld [vmem:[#allocation11] ss:$0 sm:$0xff]  ;;  %v1800_v53 = vld [vmem:[#allocation17] ss:$0 sm:$0xff] }
 0x119   :  { %1928 = vmatprep.mubr.msk.bf16.mxu1 %vm2487_vm1, %v2486_v16  ;;  %s1772_s9 = sshll.u32 %s2489_s4, 4  ;;  %s1773_s9 = int_to_ptr.vmem [resolvable:$true] %s1772_s9 }
 0x11a   :  { %285 = vadd.xlane.f32.xlu0 %v284_v3  ;;  %1919 = vmatpush3.bf16.msra.mxu0 %v2085_v17  ;;  %p2434_p7 = scmp.lt.s32.totalorder %s1773_s9, %s1773_s9 }
 0x11b   :  { %1927 = vmatpush3.bf16.msra.mxu1 %v2086_v18  ;;  %1932 = vmatprep.subr.bf16.mxu0 %v2486_v16 }
 0x11c   :  { %1940 = vmatprep.subr.bf16.mxu1 %v2486_v16 }
 0x1a3   :  { %v283_v4 = vpop.xlane.xlu0 %282 }
 0x1a4   :  { %v288_v5 = vmul.f32 0.03125, %v283_v4 }
 0x1a6   :  { %v290_v6 = vsub.f32 %v2795_v0, %v288_v5 }
 0x1a7   :  { %v286_v7 = vpop.xlane.xlu0 %285 }
 0x1a8   :  { %v289_v8 = vmul.f32 0.03125, %v286_v7  ;;  %v292_v9 = vmul.f32 %v290_v6, %v290_v6  ;;  %v248_v7 = vlaneseq }
 0x1aa   :  { %v291_v10 = vsub.f32 %v2797_v1, %v289_v8  ;;  %v294_v11 = vsel %vm280_vm0, %v292_v9, 0.0  ;;  %v254_v8 = vld [vmem:[#allocation5] sm:$0x1]  ;;  %v249_v9 = vshrl.u32 %v248_v7, 7  ;;  %v251_v15 = vand.u32 127, %v248_v7 }
 0x1ab   :  { %295 = vadd.xlane.f32.xlu1 %v294_v11  ;;  %vm256_vm3 = vcmp.lt.f32.partialorder %v254_v8, 0.5 }
 0x1ac   :  { %v293_v12 = vmul.f32 %v291_v10, %v291_v10  ;;  %v264_v11 = vsub.s32 0, %v249_v9  ;;  %vm252_vm5 = vcmp.gt.s32.totalorder %v251_v15, %v249_v9  ;;  %vm253_vm8 = vcmp.ne.s32.totalorder %v251_v15, %v249_v9 }
 0x1ae   :  { %v297_v13 = vsel %vm280_vm0, %v293_v12, 0.0  ;;  %v2488_v12 = vmov 0  }
 0x1af   :  { %298 = vadd.xlane.f32.xlu1 %v297_v13  ;;  %v260_v13 = vsel %vm256_vm3, 1, %v2488_v12 }
 0x1b0   :  { %v265_v17 = vrot.slane %v260_v13, %v264_v11 }
 0x1b2   :  { %vm270_vm6 = vcmp.eq.s32.totalorder %v265_v17, 1 }
 0x1b3   :  { %vm272_vm9 = vmor %vm252_vm5, %vm270_vm6 }
 0x1b4   :  { %vm2842_vm11 = vmand %vm253_vm8, %vm272_vm9 }
 0x238   :  { %v296_v19 = vpop.xlane.xlu1 %295 }
 0x239   :  { %v300_v20 = vmul.f32 0.03125, %v296_v19 }
 0x23b   :  { %v302_v21 = vadd.f32 1e-05, %v300_v20 }
 0x23c   :  { %v299_v22 = vpop.xlane.xlu1 %298 }
 0x23d   :  { %2107 = vrsqrt.f32 %v302_v21  ;;  %v301_v23 = vmul.f32 0.03125, %v299_v22 }
 0x23f   :  { %v303_v24 = vadd.f32 1e-05, %v301_v23 }
 0x241   :  { %2109 = vrsqrt.f32 %v303_v24 }
 0x247   :  { %v2108_v25 = vpop.eup %2107 }
 0x248   :  { %v306_v26 = vmul.f32 %v2108_v25, %v290_v6 }
 0x24a   :  { %v314_v30 = vmul.f32 %v1790_v27, %v306_v26 }
 0x24b   :  { %v2110_v28 = vpop.eup %2109 }
 0x24c   :  { %v307_v29 = vmul.f32 %v2110_v28, %v291_v10  ;;  %v322_v33 = vadd.f32 %v1791_v31, %v314_v30  ;;  %v255_v10 = vld [vmem:[#allocation5 + $0x1] sm:$0x1] }
 0x24d   :  { %vm257_vm4 = vcmp.lt.f32.partialorder %v255_v10, 0.5 }
 0x24e   :  { %v315_v32 = vmul.f32 %v1790_v27, %v307_v29  ;;  %v261_v14 = vsel %vm257_vm4, 1, %v2488_v12 }
 0x24f   :  { %v269_v18 = vrot.slane %v261_v14, %v264_v11 }
 0x250   :  { %v323_v34 = vadd.f32 %v1791_v31, %v315_v32 }
 0x251   :  { %vm271_vm7 = vcmp.eq.s32.totalorder %v269_v18, 1 }
 0x252   :  { %v324_v36 = vpack.c.bf16 %v323_v34, %v322_v33  ;;  %vm273_vm10 = vmor %vm252_vm5, %vm271_vm7 }
 0x253   :  { %vm2846_vm13 = vmand %vm253_vm8, %vm273_vm10 }
 0x254   :  { %1921 = vmatmul.mubr.msk.bf16.vlgmr.msra.gmra.mrb[0].mxu0 %vm280_vm0, %v324_v36  ;;  %1929 = vmatmul.mubr.msk.bf16.vlgmr.msra.gmra.mrb[0].mxu1 %vm280_vm0, %v324_v36 }
 0x255   :  { %1933 = vmatpush3.bf16.msra.mxu0 %v2087_v35  ;;  %1936 = vmatprep.mubr.msk.bf16.mxu0 %vm2487_vm1, %v2486_v16 }
 0x256   :  { %1934 = vmatprep.subr.bf16.mxu0 %v2486_v16  ;;  %1942 = vmatprep.mubr.msk.bf16.mxu1 %vm2487_vm1, %v2486_v16 }
 0x259   :  { %1935 = vmatpush3.bf16.msra.mxu0 %v2088_v37 }
 0x25a   :  { %1946 = vmatprep.subr.bf16.mxu0 %v2486_v16 }
 0x25c   :  { %1937 = vmatmul.mubr.msk.bf16.vlgmr.msra.gmra.mrb[4].mxu0 %vm280_vm0, %v324_v36 }
 0x25d   :  { %1948 = vmatprep.mubr.msk.bf16.mxu0 %vm2487_vm1, %v2486_v16 }
 0x327   :  { %v385_v39 = vpop.f32.mrb[0].mxu0  ;;  %v449_v40 = vpop.f32.mrb[0].mxu1 }
 0x328   :  { %v450_v41 = vadd.f32 %v1796_v38, %v449_v40  ;;  %v1922_v42 = vpop.f32.mrb[1].mxu0  ;;  %v1930_v43 = vpop.f32.mrb[1].mxu1  ;;  %v386_v54 = vadd.f32 %v1792_v50, %v385_v39 }
 0x329   :  { %v388_v44 = vpop.f32.mrb[2].mxu0  ;;  %v452_v45 = vpop.f32.mrb[2].mxu1 }
 0x32a   :  { %v522_v46 = vpack.c.bf16 %v450_v41, %v450_v41  ;;  %v453_v47 = vadd.f32 %v1796_v38, %v452_v45  ;;  %v1923_v48 = vpop.f32.mrb[3].mxu0  ;;  %v1931_v49 = vpop.f32.mrb[3].mxu1  ;;  %v389_v57 = vadd.f32 %v1792_v50, %v388_v44  ;;  %v520_v61 = vpack.c.bf16 %v386_v54, %v386_v54 }
 0x32b   :  { %v2089_v48 = vld [vmem:[%s3051_s10] sm:$0xff]  }
 0x32c   :  { %v530_v51 = vsel %vm280_vm0, %v522_v46, 0  ;;  %v523_v52 = vpack.c.bf16 %v453_v47, %v453_v47  ;;  %v521_v3 = vpack.c.bf16 %v389_v57, %v389_v57 }
 0x32d   :  { %1941 = vmatpush3.bf16.xpose.msra.mxu1 %v530_v51 }
 0x32e   :  { %v576_v55 = vsel %vm280_vm0, %v523_v52, 0  ;;  %1952 = vmatprep.subr.bf16.mxu1 %v2486_v16  ;;  %v2090_v52 = vld [vmem:[%s3051_s10 + $0x8] sm:$0xff]  }
 0x32f   :  { %v513_v56 = vpop.f32.mrb[4].mxu0  ;;  %1947 = vmatpush3.bf16.xpose.msra.mxu0 %v576_v55 }
 0x330   :  { %v514_v58 = vadd.f32 %v1800_v53, %v513_v56  ;;  %v1938_v59 = vpop.f32.mrb[5].mxu0  ;;  %1958 = vmatprep.subr.bf16.mxu0 %v2486_v16 }
 0x331   :  { %v516_v60 = vpop.f32.mrb[6].mxu0 }
 0x332   :  { %v524_v62 = vpack.c.bf16 %v514_v58, %v514_v58  ;;  %v517_v63 = vadd.f32 %v1800_v53, %v516_v60  ;;  %v1939_v2 = vpop.f32.mrb[7].mxu0 }
 0x334   :  { %v650_v4 = vsel %vm648_vm2, %v524_v62, 0  ;;  %v525_v5 = vpack.c.bf16 %v517_v63, %v517_v63  ;;  %1943 = vmatmul.mubr.msk.bf16.vlgmr.msra.gmra.mrb[4].mxu1 %vm280_vm0, %v520_v61  ;;  %v1808_v62 = vld [vmem:[#allocation19] ss:$0 sm:$0xff] }
 0x335   :  { %1953 = vmatpush3.bf16.msra.mxu1 %v650_v4  ;;  %1954 = vmatprep.mubr.msk.bf16.mxu1 %vm2487_vm1, %v2486_v16 }
 0x336   :  { %v696_v6 = vsel %vm648_vm2, %v525_v5, 0  ;;  %1949 = vmatmul.mubr.msk.bf16.vlgmr.msra.gmra.mrb[8].mxu0 %vm280_vm0, %v521_v3  ;;  %1964 = vmatprep.subr.bf16.mxu1 %v2486_v16 }
 0x337   :  { %1959 = vmatpush3.bf16.msra.mxu0 %v696_v6  ;;  %1960 = vmatprep.mubr.msk.bf16.mxu0 %vm2487_vm1, %v2486_v16 }
 0x338   :  { %1972 = vmatprep.subr.bf16.mxu0 %v2486_v16 }
 0x407   :  { %v566_v20 = vpop.f32.mrb[4].mxu1 }
 0x408   :  { %v618_v22 = vsel %vm2842_vm11, -1e+30, %v566_v20  ;;  %v1944_v23 = vpop.f32.mrb[5].mxu1 }
 0x409   :  { %v569_v24 = vpop.f32.mrb[6].mxu1  ;;  %v612_v25 = vpop.f32.mrb[8].mxu0  ;;  %v621_v26 = vsel %vm620_vm12, %v618_v22, -inf  ;;  %v2092_v23 = vld [vmem:[#allocation20 + $0x8] sm:$0xff]  }
 0x40a   :  { %v619_v27 = vsel %vm2846_vm13, -1e+30, %v612_v25  ;;  %622 = vmax.xlane.f32.xlu0 %v621_v26  ;;  %v1945_v28 = vpop.f32.mrb[7].mxu1  ;;  %v1950_v29 = vpop.f32.mrb[9].mxu0 }
 0x40b   :  { %v615_v30 = vpop.f32.mrb[10].mxu0  ;;  %v624_v31 = vsel %vm620_vm12, %v619_v27, -inf }
 0x40c   :  { %625 = vmax.xlane.f32.xlu1 %v624_v31  ;;  %v1951_v32 = vpop.f32.mrb[11].mxu0  ;;  %v1812_v31 = vld [vmem:[%s3053_s12] ss:$0 sm:$0xff] }
 0x497   :  { %v623_v33 = vpop.xlane.xlu0 %622 }
 0x498   :  { %v627_v34 = vsub.f32 %v618_v22, %v623_v33  ;;  %v2091_v22 = vld [vmem:[#allocation20] sm:$0xff]  }
 0x499   :  { %v626_v35 = vpop.xlane.xlu1 %625 }
 0x49a   :  { %v629_v36 = vmul.f32 1.442695, %v627_v34  ;;  %v628_v37 = vsub.f32 %v619_v27, %v626_v35 }
 0x49c   :  { %2111 = vpow2.f32 %v629_v36  ;;  %v631_v38 = vmul.f32 1.442695, %v628_v37  ;;  %v1813_v36 = vld [vmem:[%s3054_s13] ss:$0 sm:$0xff] }
 0x49e   :  { %2113 = vpow2.f32 %v631_v38 }
 0x4a6   :  { %v2112_v39 = vpop.eup %2111 }
 0x4a7   :  { %v633_v40 = vsel %vm620_vm12, %v2112_v39, 0.0 }
 0x4a8   :  { %v2114_v41 = vpop.eup %2113  ;;  %634 = vadd.xlane.f32.xlu0 %v633_v40 }
 0x4a9   :  { %v636_v42 = vsel %vm620_vm12, %v2114_v41, 0.0 }
 0x4aa   :  { %637 = vadd.xlane.f32.xlu1 %v636_v42  ;;  %v2094_v42 = vld [vmem:[#allocation22 + $0x8] sm:$0xff]  }
 0x535   :  { %v635_v43 = vpop.xlane.xlu0 %634 }
 0x536   :  { %2115 = vrcp.f32 %v635_v43  ;;  %v1814_v43 = vld [vmem:[%s3056_s15] ss:$0 sm:$0xff] }
 0x537   :  { %v638_v44 = vpop.xlane.xlu1 %637 }
 0x538   :  { %2117 = vrcp.f32 %v638_v44 }
 0x540   :  { %v2116_v45 = vpop.eup %2115 }
 0x541   :  { %v641_v46 = vmul.f32 %v2116_v45, %v2112_v39 }
 0x542   :  { %v2118_v47 = vpop.eup %2117 }
 0x543   :  { %v642_v49 = vmul.f32 %v2118_v47, %v2114_v41  ;;  %v643_v50 = vpack.c.bf16 %v641_v46, %v641_v46  ;;  %v2093_v41 = vld [vmem:[#allocation22] sm:$0xff]  }
 0x545   :  { %1955 = vmatmul.mubr.msk.bf16.vlgmr.msra.gmra.mrb[8].mxu1 %vm620_vm12, %v643_v50  ;;  %v644_v51 = vpack.c.bf16 %v642_v49, %v642_v49 }
 0x546   :  { %1965 = vmatpush3.bf16.msra.mxu1 %v2089_v48  ;;  %1968 = vmatprep.mubr.msk.bf16.mxu1 %vm2487_vm1, %v2486_v16 }
 0x547   :  { %1961 = vmatmul.mubr.msk.bf16.vlgmr.msra.gmra.mrb[12].mxu0 %vm620_vm12, %v644_v51  ;;  %1966 = vmatprep.subr.bf16.mxu1 %v2486_v16 }
 0x548   :  { %1976 = vmatprep.mubr.msk.bf16.mxu0 %vm2487_vm1, %v2486_v16  ;;  %1973 = vmatpush3.bf16.msra.mxu0 %v2091_v22 }
 0x549   :  { %1974 = vmatprep.subr.bf16.mxu0 %v2486_v16 }
 0x54a   :  { %1967 = vmatpush3.bf16.msra.mxu1 %v2090_v52 }
 0x54b   :  { %1980 = vmatprep.subr.bf16.mxu1 %v2486_v16 }
 0x54c   :  { %1975 = vmatpush3.bf16.msra.mxu0 %v2092_v23 }
 0x54d   :  { %1988 = vmatprep.subr.bf16.mxu0 %v2486_v16 }
 0x618   :  { %v686_v53 = vpop.f32.mrb[8].mxu1 }
 0x619   :  { %v1956_v54 = vpop.f32.mrb[9].mxu1 }
 0x61a   :  { %v689_v55 = vpop.f32.mrb[10].mxu1  ;;  %v732_v56 = vpop.f32.mrb[12].mxu0 }
 0x61b   :  { %v738_v57 = vpack.c.bf16 %v732_v56, %v686_v53  ;;  %v1957_v58 = vpop.f32.mrb[11].mxu1  ;;  %v1962_v59 = vpop.f32.mrb[13].mxu0  ;;  %v1818_v53 = vld [vmem:[%s3058_s17] ss:$0 sm:$0xff] }
 0x61c   :  { %v735_v60 = vpop.f32.mrb[14].mxu0 }
 0x61d   :  { %v1963_v61 = vpop.f32.mrb[15].mxu0  ;;  %1969 = vmatmul.mubr.msk.bf16.vlgmr.msra.gmra.mrb[12].mxu1 %vm280_vm0, %v738_v57 }
 0x61e   :  { %1984 = vmatprep.mubr.msk.bf16.mxu1 %vm2487_vm1, %v2486_v16  ;;  %1981 = vmatpush3.bf16.msra.mxu1 %v2093_v41 }
 0x61f   :  { %1982 = vmatprep.subr.bf16.mxu1 %v2486_v16 }
 0x622   :  { %1983 = vmatpush3.bf16.msra.mxu1 %v2094_v42 }
 0x623   :  { %1996 = vmatprep.subr.bf16.mxu1 %v2486_v16 }
 0x6f0   :  { %v799_v63 = vpop.f32.mrb[12].mxu1 }
 0x6f1   :  { %v800_v2 = vadd.f32 %v1808_v62, %v799_v63  ;;  %v1970_v3 = vpop.f32.mrb[13].mxu1 }
 0x6f2   :  { %v802_v4 = vpop.f32.mrb[14].mxu1 }
 0x6f3   :  { %v2876_v5 = vadd.f32 %v800_v2, %v2795_v0  ;;  %v803_v6 = vadd.f32 %v1808_v62, %v802_v4  ;;  %v1971_v7 = vpop.f32.mrb[15].mxu1 }
 0x6f5   :  { %v2879_v8 = vadd.f32 %v803_v6, %v2797_v1  ;;  %v810_v9 = vsel %vm280_vm0, %v2876_v5, 0.0 }
 0x6f6   :  { %811 = vadd.xlane.f32.xlu0 %v810_v9 }
 0x6f7   :  { %v813_v10 = vsel %vm280_vm0, %v2879_v8, 0.0 }
 0x6f8   :  { %814 = vadd.xlane.f32.xlu1 %v813_v10 }
 0x783   :  { %v812_v11 = vpop.xlane.xlu0 %811 }
 0x784   :  { %v816_v12 = vmul.f32 0.03125, %v812_v11 }
 0x785   :  { %v815_v13 = vpop.xlane.xlu1 %814 }
 0x786   :  { %v818_v14 = vsub.f32 %v2876_v5, %v816_v12  ;;  %v817_v0 = vmul.f32 0.03125, %v815_v13  ;;  %v2095_v12 = vld [vmem:[#allocation10 + $0x10] sm:$0xff]  }
 0x787   :  { %v2096_v13 = vld [vmem:[#allocation13 + $0x10] sm:$0xff]  }
 0x788   :  { %v819_v15 = vsub.f32 %v2879_v8, %v817_v0  ;;  %v820_v17 = vmul.f32 %v818_v14, %v818_v14  ;;  %v2098_v0 = vld [vmem:[#allocation13 + $0x18] sm:$0xff]  }
 0x78a   :  { %v822_v1 = vsel %vm280_vm0, %v820_v17, 0.0  ;;  %v821_v18 = vmul.f32 %v819_v15, %v819_v15 }
 0x78b   :  { %823 = vadd.xlane.f32.xlu0 %v822_v1 }
 0x78c   :  { %v825_v20 = vsel %vm280_vm0, %v821_v18, 0.0 }
 0x78d   :  { %826 = vadd.xlane.f32.xlu1 %v825_v20 }
 0x818   :  { %v824_v24 = vpop.xlane.xlu0 %823 }
 0x819   :  { %v828_v25 = vmul.f32 0.03125, %v824_v24  ;;  %v1822_v24 = vld [vmem:[#allocation7 + $0x1] ss:$0 sm:$0xff] }
 0x81a   :  { %v827_v26 = vpop.xlane.xlu1 %826 }
 0x81b   :  { %v830_v27 = vadd.f32 1e-05, %v828_v25  ;;  %v829_v28 = vmul.f32 0.03125, %v827_v26 }
 0x81d   :  { %2119 = vrsqrt.f32 %v830_v27  ;;  %v831_v29 = vadd.f32 1e-05, %v829_v28 }
 0x81f   :  { %2121 = vrsqrt.f32 %v831_v29  ;;  %v1823_v29 = vld [vmem:[#allocation8 + $0x1] ss:$0 sm:$0xff] }
 0x827   :  { %v2120_v30 = vpop.eup %2119 }
 0x828   :  { %v834_v32 = vmul.f32 %v2120_v30, %v818_v14  ;;  %v2097_v14 = vld [vmem:[#allocation10 + $0x18] sm:$0xff]  }
 0x829   :  { %v2122_v33 = vpop.eup %2121 }
 0x82a   :  { %v842_v34 = vmul.f32 %v1812_v31, %v834_v32  ;;  %v835_v35 = vmul.f32 %v2122_v33, %v819_v15  ;;  %v2099_v33 = vld [vmem:[#allocation16 + $0x10] sm:$0xff]  }
 0x82c   :  { %v843_v37 = vmul.f32 %v1812_v31, %v835_v35  ;;  %v850_v38 = vadd.f32 %v1813_v36, %v842_v34  ;;  %v2100_v35 = vld [vmem:[#allocation16 + $0x18] sm:$0xff]  }
 0x82e   :  { %v851_v39 = vadd.f32 %v1813_v36, %v843_v37  ;;  %v1828_v36 = vld [vmem:[#allocation14 + $0x1] ss:$0 sm:$0xff] }
 0x830   :  { %v852_v40 = vpack.c.bf16 %v851_v39, %v850_v38 }
 0x832   :  { %1977 = vmatmul.mubr.msk.bf16.vlgmr.msra.gmra.mrb[16].mxu0 %vm280_vm0, %v852_v40 }
 0x833   :  { %1992 = vmatprep.mubr.msk.bf16.mxu0 %vm2487_vm1, %v2486_v16  ;;  %1989 = vmatpush3.bf16.msra.mxu0 %v2095_v12 }
 0x834   :  { %1990 = vmatprep.subr.bf16.mxu0 %v2486_v16 }
 0x837   :  { %1991 = vmatpush3.bf16.msra.mxu0 %v2097_v14 }
 0x838   :  { %2004 = vmatprep.subr.bf16.mxu0 %v2486_v16 }
 0x905   :  { %v913_v44 = vpop.f32.mrb[16].mxu0 }
 0x906   :  { %v914_v45 = vadd.f32 %v1814_v43, %v913_v44  ;;  %v1978_v46 = vpop.f32.mrb[17].mxu0 }
 0x907   :  { %v916_v47 = vpop.f32.mrb[18].mxu0 }
 0x908   :  { %v917_v48 = vadd.f32 %v1814_v43, %v916_v47  ;;  %v1979_v49 = vpop.f32.mrb[19].mxu0  ;;  %v920_v50 = vmax.f32 %v914_v45, 0.0 }
 0x90a   :  { %v921_v51 = vmax.f32 %v917_v48, 0.0  ;;  %v1824_v48 = vld [vmem:[#allocation11 + $0x1] ss:$0 sm:$0xff] }
 0x90c   :  { %v922_v52 = vpack.c.bf16 %v921_v51, %v920_v50  ;;  %v1832_v51 = vld [vmem:[#allocation17 + $0x1] ss:$0 sm:$0xff] }
 0x90e   :  { %1985 = vmatmul.mubr.msk.bf16.vlgmr.msra.gmra.mrb[16].mxu1 %vm280_vm0, %v922_v52 }
 0x90f   :  { %2000 = vmatprep.mubr.msk.bf16.mxu1 %vm2487_vm1, %v2486_v16  ;;  %1997 = vmatpush3.bf16.msra.mxu1 %v2096_v13 }
 0x910   :  { %1998 = vmatprep.subr.bf16.mxu1 %v2486_v16 }
 0x913   :  { %1999 = vmatpush3.bf16.msra.mxu1 %v2098_v0 }
 0x914   :  { %2012 = vmatprep.subr.bf16.mxu1 %v2486_v16 }
 0x9e1   :  { %v983_v54 = vpop.f32.mrb[16].mxu1 }
 0x9e2   :  { %v984_v55 = vadd.f32 %v1818_v53, %v983_v54  ;;  %v1986_v56 = vpop.f32.mrb[17].mxu1 }
 0x9e3   :  { %v986_v57 = vpop.f32.mrb[18].mxu1 }
 0x9e4   :  { %v2912_v58 = vadd.f32 %v984_v55, %v2876_v5  ;;  %v987_v59 = vadd.f32 %v1818_v53, %v986_v57  ;;  %v1987_v60 = vpop.f32.mrb[19].mxu1 }
 0x9e6   :  { %v2915_v61 = vadd.f32 %v987_v59, %v2879_v8  ;;  %v996_v62 = vsel %vm280_vm0, %v2912_v58, 0.0 }
 0x9e7   :  { %997 = vadd.xlane.f32.xlu0 %v996_v62 }
 0x9e8   :  { %v999_v63 = vsel %vm280_vm0, %v2915_v61, 0.0 }
 0x9e9   :  { %1000 = vadd.xlane.f32.xlu1 %v999_v63 }
 0xa74   :  { %v998_v2 = vpop.xlane.xlu0 %997 }
 0xa75   :  { %v1002_v3 = vmul.f32 0.03125, %v998_v2 }
 0xa76   :  { %v1001_v4 = vpop.xlane.xlu1 %1000 }
 0xa77   :  { %v1004_v6 = vsub.f32 %v2912_v58, %v1002_v3  ;;  %v1003_v5 = vmul.f32 0.03125, %v1001_v4 }
 0xa79   :  { %v1005_v7 = vsub.f32 %v2915_v61, %v1003_v5  ;;  %v1006_v9 = vmul.f32 %v1004_v6, %v1004_v6 }
 0xa7b   :  { %v1008_v8 = vsel %vm280_vm0, %v1006_v9, 0.0  ;;  %v1007_v10 = vmul.f32 %v1005_v7, %v1005_v7 }
 0xa7c   :  { %1009 = vadd.xlane.f32.xlu0 %v1008_v8 }
 0xa7d   :  { %v1011_v11 = vsel %vm280_vm0, %v1007_v10, 0.0 }
 0xa7e   :  { %1012 = vadd.xlane.f32.xlu1 %v1011_v11 }
 0xb09   :  { %v1010_v15 = vpop.xlane.xlu0 %1009 }
 0xb0a   :  { %v1014_v17 = vmul.f32 0.03125, %v1010_v15 }
 0xb0b   :  { %v1013_v1 = vpop.xlane.xlu1 %1012 }
 0xb0c   :  { %v1016_v18 = vadd.f32 1e-05, %v1014_v17  ;;  %v1015_v20 = vmul.f32 0.03125, %v1013_v1 }
 0xb0e   :  { %2123 = vrsqrt.f32 %v1016_v18  ;;  %v1017_v22 = vadd.f32 1e-05, %v1015_v20 }
 0xb10   :  { %2125 = vrsqrt.f32 %v1017_v22 }
 0xb18   :  { %v2124_v23 = vpop.eup %2123 }
 0xb19   :  { %v1020_v25 = vmul.f32 %v2124_v23, %v1004_v6 }
 0xb1a   :  { %v2126_v26 = vpop.eup %2125 }
 0xb1b   :  { %v1028_v27 = vmul.f32 %v1822_v24, %v1020_v25  ;;  %v1021_v28 = vmul.f32 %v2126_v26, %v1005_v7 }
 0xb1d   :  { %v1029_v30 = vmul.f32 %v1822_v24, %v1021_v28  ;;  %v1036_v31 = vadd.f32 %v1823_v29, %v1028_v27 }
 0xb1f   :  { %v1037_v32 = vadd.f32 %v1823_v29, %v1029_v30 }
 0xb21   :  { %v1038_v34 = vpack.c.bf16 %v1037_v32, %v1036_v31 }
 0xb23   :  { %1993 = vmatmul.mubr.msk.bf16.vlgmr.msra.gmra.mrb[20].mxu0 %vm280_vm0, %v1038_v34  ;;  %2001 = vmatmul.mubr.msk.bf16.vlgmr.msra.gmra.mrb[20].mxu1 %vm280_vm0, %v1038_v34 }
 0xb24   :  { %2005 = vmatpush3.bf16.msra.mxu0 %v2099_v33  ;;  %2008 = vmatprep.mubr.msk.bf16.mxu0 %vm2487_vm1, %v2486_v16  ;;  %v2101_v33 = vld [vmem:[%s3051_s10 + $0x10] sm:$0xff]  }
 0xb25   :  { %2006 = vmatprep.subr.bf16.mxu0 %v2486_v16  ;;  %2014 = vmatprep.mubr.msk.bf16.mxu1 %vm2487_vm1, %v2486_v16 }
 0xb28   :  { %2007 = vmatpush3.bf16.msra.mxu0 %v2100_v35 }
 0xb29   :  { %2018 = vmatprep.subr.bf16.mxu0 %v2486_v16 }
 0xb2b   :  { %2009 = vmatmul.mubr.msk.bf16.vlgmr.msra.gmra.mrb[24].mxu0 %vm280_vm0, %v1038_v34 }
 0xb2c   :  { %2020 = vmatprep.mubr.msk.bf16.mxu0 %vm2487_vm1, %v2486_v16 }
 0xbf6   :  { %v1101_v37 = vpop.f32.mrb[20].mxu0  ;;  %v1167_v38 = vpop.f32.mrb[20].mxu1 }
 0xbf7   :  { %v1168_v39 = vadd.f32 %v1828_v36, %v1167_v38  ;;  %v1994_v40 = vpop.f32.mrb[21].mxu0  ;;  %v2002_v41 = vpop.f32.mrb[21].mxu1  ;;  %v1102_v52 = vadd.f32 %v1824_v48, %v1101_v37  ;;  %v2102_v37 = vld [vmem:[%s3051_s10 + $0x18] sm:$0xff]  }
 0xbf8   :  { %v1104_v42 = vpop.f32.mrb[22].mxu0  ;;  %v1170_v43 = vpop.f32.mrb[22].mxu1 }
 0xbf9   :  { %v1242_v44 = vpack.c.bf16 %v1168_v39, %v1168_v39  ;;  %v1171_v45 = vadd.f32 %v1828_v36, %v1170_v43  ;;  %v1995_v46 = vpop.f32.mrb[23].mxu0  ;;  %v2003_v47 = vpop.f32.mrb[23].mxu1  ;;  %v1105_v55 = vadd.f32 %v1824_v48, %v1104_v42  ;;  %v1240_v60 = vpack.c.bf16 %v1102_v52, %v1102_v52 }
 0xbfa   :  { %v1844_v47 = vld [vmem:[#allocation19 + $0x1] ss:$0 sm:$0xff] }
 0xbfb   :  { %v1250_v49 = vsel %vm280_vm0, %v1242_v44, 0  ;;  %v1243_v50 = vpack.c.bf16 %v1171_v45, %v1171_v45  ;;  %v1241_v3 = vpack.c.bf16 %v1105_v55, %v1105_v55 }
 0xbfc   :  { %2013 = vmatpush3.bf16.xpose.msra.mxu1 %v1250_v49 }
 0xbfd   :  { %v1296_v53 = vsel %vm280_vm0, %v1243_v50, 0  ;;  %2024 = vmatprep.subr.bf16.mxu1 %v2486_v16 }
 0xbfe   :  { %v1233_v54 = vpop.f32.mrb[24].mxu0  ;;  %2019 = vmatpush3.bf16.xpose.msra.mxu0 %v1296_v53 }
 0xbff   :  { %v1234_v56 = vadd.f32 %v1832_v51, %v1233_v54  ;;  %v2010_v57 = vpop.f32.mrb[25].mxu0  ;;  %2030 = vmatprep.subr.bf16.mxu0 %v2486_v16 }
 0xc00   :  { %v1236_v59 = vpop.f32.mrb[26].mxu0 }
 0xc01   :  { %v1244_v62 = vpack.c.bf16 %v1234_v56, %v1234_v56  ;;  %v1237_v63 = vadd.f32 %v1832_v51, %v1236_v59  ;;  %v2011_v2 = vpop.f32.mrb[27].mxu0 }
 0xc03   :  { %v1368_v4 = vsel %vm648_vm2, %v1244_v62, 0  ;;  %v1245_v6 = vpack.c.bf16 %v1237_v63, %v1237_v63  ;;  %2015 = vmatmul.mubr.msk.bf16.vlgmr.msra.gmra.mrb[24].mxu1 %vm280_vm0, %v1240_v60 }
 0xc04   :  { %2025 = vmatpush3.bf16.msra.mxu1 %v1368_v4  ;;  %2026 = vmatprep.mubr.msk.bf16.mxu1 %vm2487_vm1, %v2486_v16 }
 0xc05   :  { %v1414_v5 = vsel %vm648_vm2, %v1245_v6, 0  ;;  %2021 = vmatmul.mubr.msk.bf16.vlgmr.msra.gmra.mrb[28].mxu0 %vm280_vm0, %v1241_v3  ;;  %2036 = vmatprep.subr.bf16.mxu1 %v2486_v16 }
 0xc06   :  { %2031 = vmatpush3.bf16.msra.mxu0 %v1414_v5  ;;  %2032 = vmatprep.mubr.msk.bf16.mxu0 %vm2487_vm1, %v2486_v16  ;;  %v2103_v5 = vld [vmem:[#allocation20 + $0x10] sm:$0xff]  }
 0xc07   :  { %2044 = vmatprep.subr.bf16.mxu0 %v2486_v16 }
 0xcd6   :  { %v1286_v7 = vpop.f32.mrb[24].mxu1 }
 0xcd7   :  { %v1338_v9 = vsel %vm2842_vm11, -1e+30, %v1286_v7  ;;  %v2016_v8 = vpop.f32.mrb[25].mxu1  ;;  %v2104_v7 = vld [vmem:[#allocation20 + $0x18] sm:$0xff]  }
 0xcd8   :  { %v1289_v10 = vpop.f32.mrb[26].mxu1  ;;  %v1332_v11 = vpop.f32.mrb[28].mxu0  ;;  %v1340_v12 = vsel %vm620_vm12, %v1338_v9, -inf }
 0xcd9   :  { %v1339_v13 = vsel %vm2846_vm13, -1e+30, %v1332_v11  ;;  %1341 = vmax.xlane.f32.xlu0 %v1340_v12  ;;  %v2017_v14 = vpop.f32.mrb[27].mxu1  ;;  %v2022_v0 = vpop.f32.mrb[29].mxu0 }
 0xcda   :  { %v1335_v15 = vpop.f32.mrb[30].mxu0  ;;  %v1343_v17 = vsel %vm620_vm12, %v1339_v13, -inf  ;;  %v1850_v0 = vld [vmem:[%s3053_s12 + $0x1] ss:$0 sm:$0xff] }
 0xcdb   :  { %1344 = vmax.xlane.f32.xlu1 %v1343_v17  ;;  %v2023_v1 = vpop.f32.mrb[31].mxu0 }
 0xd66   :  { %v1342_v18 = vpop.xlane.xlu0 %1341 }
 0xd67   :  { %v1346_v20 = vsub.f32 %v1338_v9, %v1342_v18 }
 0xd68   :  { %v1345_v19 = vpop.xlane.xlu1 %1344 }
 0xd69   :  { %v1348_v22 = vmul.f32 1.442695, %v1346_v20  ;;  %v1347_v23 = vsub.f32 %v1339_v13, %v1345_v19  ;;  %v1851_v20 = vld [vmem:[%s3054_s13 + $0x1] ss:$0 sm:$0xff] }
 0xd6b   :  { %2127 = vpow2.f32 %v1348_v22  ;;  %v1350_v24 = vmul.f32 1.442695, %v1347_v23 }
 0xd6d   :  { %2129 = vpow2.f32 %v1350_v24 }
 0xd75   :  { %v2128_v25 = vpop.eup %2127 }
 0xd76   :  { %v1352_v21 = vsel %vm620_vm12, %v2128_v25, 0.0 }
 0xd77   :  { %v2130_v26 = vpop.eup %2129  ;;  %1353 = vadd.xlane.f32.xlu0 %v1352_v21  ;;  %v2106_v21 = vld [vmem:[#allocation22 + $0x18] sm:$0xff]  }
 0xd78   :  { %v1355_v27 = vsel %vm620_vm12, %v2130_v26, 0.0 }
 0xd79   :  { %1356 = vadd.xlane.f32.xlu1 %v1355_v27 }
 0xe04   :  { %v1354_v28 = vpop.xlane.xlu0 %1353 }
 0xe05   :  { %2131 = vrcp.f32 %v1354_v28 }
 0xe06   :  { %v1357_v29 = vpop.xlane.xlu1 %1356 }
 0xe07   :  { %2133 = vrcp.f32 %v1357_v29 }
 0xe0f   :  { %v2132_v30 = vpop.eup %2131 }
 0xe10   :  { %v1360_v31 = vmul.f32 %v2132_v30, %v2128_v25  ;;  %v2105_v25 = vld [vmem:[#allocation22 + $0x10] sm:$0xff]  }
 0xe11   :  { %v2134_v32 = vpop.eup %2133 }
 0xe12   :  { %v1361_v34 = vmul.f32 %v2134_v32, %v2130_v26  ;;  %v1362_v35 = vpack.c.bf16 %v1360_v31, %v1360_v31  ;;  %v1853_v26 = vld [vmem:[%s3056_s15 + $0x1] ss:$0 sm:$0xff] }
 0xe14   :  { %2027 = vmatmul.mubr.msk.bf16.vlgmr.msra.gmra.mrb[28].mxu1 %vm620_vm12, %v1362_v35  ;;  %v1363_v36 = vpack.c.bf16 %v1361_v34, %v1361_v34 }
 0xe15   :  { %2037 = vmatpush3.bf16.msra.mxu1 %v2101_v33  ;;  %2040 = vmatprep.mubr.msk.bf16.mxu1 %vm2487_vm1, %v2486_v16 }
 0xe16   :  { %2033 = vmatmul.mubr.msk.bf16.vlgmr.msra.gmra.mrb[32].mxu0 %vm620_vm12, %v1363_v36  ;;  %2038 = vmatprep.subr.bf16.mxu1 %v2486_v16 }
 0xe17   :  { %2048 = vmatprep.mubr.msk.bf16.mxu0 %vm2487_vm1, %v2486_v16  ;;  %2045 = vmatpush3.bf16.msra.mxu0 %v2103_v5 }
 0xe18   :  { %2046 = vmatprep.subr.bf16.mxu0 %v2486_v16 }
 0xe19   :  { %2039 = vmatpush3.bf16.msra.mxu1 %v2102_v37 }
 0xe1a   :  { %2052 = vmatprep.subr.bf16.mxu1 %v2486_v16 }
 0xe1b   :  { %2047 = vmatpush3.bf16.msra.mxu0 %v2104_v7  ;;  %v1762_v7 = vld [vmem:[%s3093_s24] sm:$0xff] }
 0xee7   :  { %v1404_v38 = vpop.f32.mrb[28].mxu1 }
 0xee8   :  { %v2028_v39 = vpop.f32.mrb[29].mxu1 }
 0xee9   :  { %v1407_v40 = vpop.f32.mrb[30].mxu1  ;;  %v1450_v41 = vpop.f32.mrb[32].mxu0 }
 0xeea   :  { %v1456_v42 = vpack.c.bf16 %v1450_v41, %v1404_v38  ;;  %v2029_v43 = vpop.f32.mrb[31].mxu1  ;;  %v2034_v44 = vpop.f32.mrb[33].mxu0 }
 0xeeb   :  { %v1453_v45 = vpop.f32.mrb[34].mxu0 }
 0xeec   :  { %v2035_v46 = vpop.f32.mrb[35].mxu0  ;;  %2041 = vmatmul.mubr.msk.bf16.vlgmr.msra.gmra.mrb[32].mxu1 %vm280_vm0, %v1456_v42 }
 0xeed   :  { %2056 = vmatprep.mubr.msk.bf16.mxu1 %vm2487_vm1, %v2486_v16  ;;  %2053 = vmatpush3.bf16.msra.mxu1 %v2105_v25 }
 0xeee   :  { %2054 = vmatprep.subr.bf16.mxu1 %v2486_v16  ;;  %v1858_v16 = vld [vmem:[%s3058_s17 + $0x1] ss:$0 sm:$0xff] }
 0xef1   :  { %2055 = vmatpush3.bf16.msra.mxu1 %v2106_v21 }
 0xfbf   :  { %v1519_v48 = vpop.f32.mrb[32].mxu1 }
 0xfc0   :  { %v1520_v49 = vadd.f32 %v1844_v47, %v1519_v48  ;;  %v2042_v50 = vpop.f32.mrb[33].mxu1 }
 0xfc1   :  { %v1522_v51 = vpop.f32.mrb[34].mxu1 }
 0xfc2   :  { %v2980_v52 = vadd.f32 %v1520_v49, %v2912_v58  ;;  %v1523_v53 = vadd.f32 %v1844_v47, %v1522_v51  ;;  %v2043_v54 = vpop.f32.mrb[35].mxu1 }
 0xfc4   :  { %v2983_v55 = vadd.f32 %v1523_v53, %v2915_v61  ;;  %v1532_v56 = vsel %vm280_vm0, %v2980_v52, 0.0 }
 0xfc5   :  { %1533 = vadd.xlane.f32.xlu0 %v1532_v56 }
 0xfc6   :  { %v1535_v57 = vsel %vm280_vm0, %v2983_v55, 0.0 }
 0xfc7   :  { %1536 = vadd.xlane.f32.xlu1 %v1535_v57 }
0x1052   :  { %v1534_v59 = vpop.xlane.xlu0 %1533 }
0x1053   :  { %v1538_v60 = vmul.f32 0.03125, %v1534_v59 }
0x1054   :  { %v1537_v62 = vpop.xlane.xlu1 %1536 }
0x1055   :  { %v1540_v63 = vsub.f32 %v2980_v52, %v1538_v60  ;;  %v1539_v58 = vmul.f32 0.03125, %v1537_v62 }
0x1057   :  { %v1541_v2 = vsub.f32 %v2983_v55, %v1539_v58  ;;  %v1542_v3 = vmul.f32 %v1540_v63, %v1540_v63 }
0x1059   :  { %v1544_v61 = vsel %vm280_vm0, %v1542_v3, 0.0  ;;  %v1543_v4 = vmul.f32 %v1541_v2, %v1541_v2 }
0x105a   :  { %1545 = vadd.xlane.f32.xlu0 %v1544_v61 }
0x105b   :  { %v1547_v6 = vsel %vm280_vm0, %v1543_v4, 0.0  ;;  %v1863_v4 = vld [vmem:[%s3092_s16] ss:$0 sm:$0xff] }
0x105c   :  { %1548 = vadd.xlane.f32.xlu1 %v1547_v6 }
0x10e7   :  { %v1546_v9 = vpop.xlane.xlu0 %1545 }
0x10e8   :  { %v1550_v8 = vmul.f32 0.03125, %v1546_v9 }
0x10e9   :  { %v1549_v10 = vpop.xlane.xlu1 %1548 }
0x10ea   :  { %v1552_v11 = vadd.f32 1e-05, %v1550_v8  ;;  %v1551_v12 = vmul.f32 0.03125, %v1549_v10 }
0x10ec   :  { %2135 = vrsqrt.f32 %v1552_v11  ;;  %v1553_v13 = vadd.f32 1e-05, %v1551_v12 }
0x10ee   :  { %2137 = vrsqrt.f32 %v1553_v13 }
0x10f6   :  { %v2136_v14 = vpop.eup %2135 }
0x10f7   :  { %v1556_v15 = vmul.f32 %v2136_v14, %v1540_v63 }
0x10f8   :  { %v2138_v17 = vpop.eup %2137 }
0x10f9   :  { %v1564_v1 = vmul.f32 %v1850_v0, %v1556_v15  ;;  %v1557_v18 = vmul.f32 %v2138_v17, %v1541_v2  ;;  %v1862_v2 = vld [vmem:[%s3059_s18] ss:$0 sm:$0xff]  ;;  %s2429_s18 = scalar_lea.vmem %s1773_s9, 256 }
0x10fa   :  { %p2430_p6 = scmp.ne.s32.totalorder %s1773_s9, %s2429_s18  ;;  %p2435_p8 = scmp.lt.s32.totalorder %s2429_s18, %s2429_s18 }
0x10fb   :  { %v1565_v19 = vmul.f32 %v1850_v0, %v1557_v18  ;;  %v1572_v22 = vadd.f32 %v1851_v20, %v1564_v1 }
0x10fc   :  { %p2436_p9 = por %p2435_p8, %p2434_p7 }
0x10fd   :  { %v1573_v23 = vadd.f32 %v1851_v20, %v1565_v19 }
0x10fe   :  { %p2437_p10 = pnand %p2436_p9, %p2430_p6 }
0x10ff   :  { %v1574_v24 = vpack.c.bf16 %v1573_v23, %v1572_v22 }
0x1101   :  { %2049 = vmatmul.mubr.msk.bf16.vlgmr.msra.gmra.mrb[36].mxu0 %vm280_vm0, %v1574_v24 }
0x11d4   :  { %v1637_v27 = vpop.f32.mrb[36].mxu0 }
0x11d5   :  { %v1638_v28 = vadd.f32 %v1853_v26, %v1637_v27  ;;  %v2050_v29 = vpop.f32.mrb[37].mxu0 }
0x11d6   :  { %v1640_v30 = vpop.f32.mrb[38].mxu0 }
0x11d7   :  { %v1641_v31 = vadd.f32 %v1853_v26, %v1640_v30  ;;  %v2051_v32 = vpop.f32.mrb[39].mxu0  ;;  %v1644_v33 = vmax.f32 %v1638_v28, 0.0 }
0x11d9   :  { %v1645_v34 = vmax.f32 %v1641_v31, 0.0 }
0x11db   :  { %v1646_v35 = vpack.c.bf16 %v1645_v34, %v1644_v33 }
0x11dd   :  { %2057 = vmatmul.mubr.msk.bf16.vlgmr.msra.gmra.mrb[36].mxu1 %vm280_vm0, %v1646_v35 }
0x12b0   :  { %v1709_v36 = vpop.f32.mrb[36].mxu1 }
0x12b1   :  { %v1710_v37 = vadd.f32 %v1858_v16, %v1709_v36  ;;  %v2058_v38 = vpop.f32.mrb[37].mxu1 }
0x12b2   :  { %v1712_v39 = vpop.f32.mrb[38].mxu1 }
0x12b3   :  { %v1713_v40 = vadd.f32 %v1858_v16, %v1712_v39  ;;  %v2059_v41 = vpop.f32.mrb[39].mxu1  ;;  %v1716_v42 = vadd.f32 %v1710_v37, %v2980_v52 }
0x12b5   :  { %v1720_v43 = vsel %vm280_vm0, %v1716_v42, 0.0  ;;  %v1717_v44 = vadd.f32 %v1713_v40, %v2983_v55 }
0x12b6   :  { %1721 = vadd.xlane.f32.xlu0 %v1720_v43 }
0x12b7   :  { %v1723_v45 = vsel %vm280_vm0, %v1717_v44, 0.0 }
0x12b8   :  { %1724 = vadd.xlane.f32.xlu1 %v1723_v45 }
0x1343   :  { %v1722_v46 = vpop.xlane.xlu0 %1721 }
0x1344   :  { %v1726_v47 = vmul.f32 0.03125, %v1722_v46 }
0x1345   :  { %v1725_v48 = vpop.xlane.xlu1 %1724 }
0x1346   :  { %v1728_v49 = vsub.f32 %v1716_v42, %v1726_v47  ;;  %v1727_v50 = vmul.f32 0.03125, %v1725_v48 }
0x1348   :  { %v1729_v51 = vsub.f32 %v1717_v44, %v1727_v50  ;;  %v1730_v53 = vmul.f32 %v1728_v49, %v1728_v49 }
0x134a   :  { %v1732_v54 = vsel %vm280_vm0, %v1730_v53, 0.0  ;;  %v1731_v56 = vmul.f32 %v1729_v51, %v1729_v51 }
0x134b   :  { %1733 = vadd.xlane.f32.xlu0 %v1732_v54 }
0x134c   :  { %v1735_v52 = vsel %vm280_vm0, %v1731_v56, 0.0 }
0x134d   :  { %1736 = vadd.xlane.f32.xlu1 %v1735_v52 }
0x13d8   :  { %v1734_v57 = vpop.xlane.xlu0 %1733 }
0x13d9   :  { %v1738_v55 = vmul.f32 0.03125, %v1734_v57 }
0x13da   :  { %v1737_v59 = vpop.xlane.xlu1 %1736 }
0x13db   :  { %v1740_v60 = vadd.f32 1e-05, %v1738_v55  ;;  %v1739_v62 = vmul.f32 0.03125, %v1737_v59 }
0x13dd   :  { %2139 = vrsqrt.f32 %v1740_v60  ;;  %v1741_v63 = vadd.f32 1e-05, %v1739_v62 }
0x13df   :  { %2141 = vrsqrt.f32 %v1741_v63 }
0x13e7   :  { %v2140_v58 = vpop.eup %2139 }
0x13e8   :  { %v1744_v3 = vmul.f32 %v2140_v58, %v1728_v49 }
0x13e9   :  { %v2142_v61 = vpop.eup %2141 }
0x13ea   :  { %v1745_v6 = vmul.f32 %v2142_v61, %v1729_v51  ;;  %v1752_v5 = vmul.f32 %v1862_v2, %v1744_v3 }
0x13ec   :  { %v1753_v9 = vmul.f32 %v1862_v2, %v1745_v6  ;;  %v1760_v8 = vadd.f32 %v1863_v4, %v1752_v5 }
0x13ee   :  { %v1761_v10 = vadd.f32 %v1863_v4, %v1753_v9  ;;  %v1763_v11 = vmul.f32 %v1762_v7, %v1760_v8 }
0x13f0   :  { %v1764_v12 = vmul.f32 %v1762_v7, %v1761_v10  ;;  %1765 = vst.msk [vmem:[#allocation23] sm:$0xff] %vm280_vm0, %v1763_v11 }
0x13f2   :  { %1766 = vst.msk [vmem:[#allocation23 + $0x8] sm:$0xff] %vm280_vm0, %v1764_v12 }
0x13f3   :  { %2440 = shalt.err (!%p2437_p10)
}
0x13f4   :  { %s3094_s2 = sld [smem:[#allocation40_spill]] }
0x13fa   :  { %s2441_s25 = scalar_lea.hbm %s3094_s2, 256 }
0x13fb   :  { %p2442_p11 = scmp.ne.s32.totalorder %s3094_s2, %s2441_s25  ;;  %p2445_p12 = scmp.lt.u32.totalorder %s2441_s25, %s3094_s2 }
0x13fd   :  { %p2447_p13 = pnand %p2445_p12, %p2442_p11 }
0x13ff   :  { %2450 = shalt.err (!%p2447_p13)
}
0x1400   :  { %1778 = dma.vmem_to_hbm [thread:$0]  %s1773_s9, 256, %s3094_s2, [#allocation4], %s2478_s14, %s2478_s14, %s2479_s29  }
0x1401   :  { %2465 = dma.done.wait [#allocation4], 256  }
0x1402   :  { %2466 = vsyncadd [#allocation4], 4294967040 }
0x1403   :  { %1782 = vsyncpa [#allocation3], 1 }
0x1404   :  { %1783 = vsyncpa [#allocation6], 1 }
0x1405   :  { %1784 = vsyncpa [#allocation9], 1 }
0x1406   :  { %1785 = vsyncpa [#allocation12], 1 }
0x1407   :  { %1786 = vsyncpa [#allocation15], 1 }
0x1408   :  { %1787 = vsyncpa [#allocation18], 1 }
0x1409   :  { %1788 = vsyncpa [#allocation21], 1 }
0x140a   :  { %1789 = vsyncpa [#allocation4], 1 }

</bundles_post_ra>
